<compile_context>
chip_gen: v7x
topology: tpu7x:2x2x1
jax: 0.10.0
libtpu: 0.0.40
codegen_flags: <defaults>
</compile_context>

<pallas_src>
import numpy as np
import jax
import jax.numpy as jnp
from jax import lax
from jax.experimental import pallas as pl
from jax.experimental.pallas import tpu as pltpu

# Safe on all generations (v5e/v6e: 128 MiB physical, v7x: 64 MiB physical).
VMEM_LIMIT_BYTES = 32 * 1024 * 1024


def _round_up(x, m):
    return ((x + m - 1) // m) * m


# -----------------------------------------------------------------------------
# Kernel 1: dense matmul + bias, tiled over rows (hoisted LSTM input projection)
# -----------------------------------------------------------------------------
def _matmul_bias_kernel(x_ref, w_ref, b_ref, o_ref):
    o_ref[...] = (jnp.dot(x_ref[...], w_ref[...],
                          preferred_element_type=jnp.float32) + b_ref[...])


def matmul_bias(x, w, b, tile_m=256):
    """[M,K] @ [K,N] + [1,N] -> [M,N], tiled over M (parallel grid)."""
    M, K = x.shape
    N = w.shape[1]
    tile = min(tile_m, _round_up(M, 8))
    Mp = _round_up(M, tile)
    if Mp != M:
        x = jnp.pad(x, ((0, Mp - M), (0, 0)))
    out = pl.pallas_call(
        _matmul_bias_kernel,
        out_shape=jax.ShapeDtypeStruct((Mp, N), jnp.float32),
        grid=(Mp // tile,),
        in_specs=[pl.BlockSpec((tile, K), lambda i: (i, 0)),
                  pl.BlockSpec((K, N), lambda i: (0, 0)),
                  pl.BlockSpec((1, N), lambda i: (0, 0))],
        out_specs=pl.BlockSpec((tile, N), lambda i: (i, 0)),
        compiler_params=pltpu.CompilerParams(
            dimension_semantics=("parallel",),
            vmem_limit_bytes=VMEM_LIMIT_BYTES),
    )(x, w, b)
    return out[:M] if Mp != M else out


# -----------------------------------------------------------------------------
# Kernel 2: BiLSTM recurrence. grid=(2,) over directions; fused gates; the
# input projection (incl. bias) is already precomputed into xp.
# -----------------------------------------------------------------------------
def _lstm_recurrence_kernel(xp_ref, whh_ref, out_ref):
    """xp: [S,B,4H] precomputed x@Wih+b for this direction; whh: [H,4H];
    out: [S,B,H]. Direction 0 = forward, 1 = backward (time index reversed)."""
    S, B, H4 = xp_ref.shape
    H = H4 // 4
    d = pl.program_id(0)
    whh = whh_ref[...]                       # hoisted out of the loop

    def step(k, carry):
        h, c = carry
        t = jnp.where(d == 0, k, S - 1 - k)  # in-kernel time reversal, no [::-1]
        gates = xp_ref[t] + jnp.dot(h, whh, preferred_element_type=jnp.float32)
        i_g = jax.nn.sigmoid(gates[:, 0 * H:1 * H])
        f_g = jax.nn.sigmoid(gates[:, 1 * H:2 * H])
        g_g = jnp.tanh(gates[:, 2 * H:3 * H])
        o_g = jax.nn.sigmoid(gates[:, 3 * H:4 * H])
        c_new = f_g * c + i_g * g_g
        h_new = o_g * jnp.tanh(c_new)
        out_ref[t] = h_new
        return h_new, c_new

    carry = (jnp.zeros((B, H), jnp.float32), jnp.zeros((B, H), jnp.float32))
    lax.fori_loop(0, S, step, carry, unroll=(True if S <= 32 else 8))


def bilstm_layer(x_tm, p):
    """Bidirectional LSTM layer, time-major in/out: [S,B,I] -> [S,B,2H]."""
    S, B, I = x_tm.shape
    H = p['whh'].shape[1]
    H4 = 4 * H
    # Hoisted input projection for BOTH directions as one big MXU matmul:
    #   [S*B, I] @ [I, 8H]  (cols 0:4H = forward gates, 4H:8H = backward gates).
    xp = matmul_bias(x_tm.reshape(S * B, I), p['wih'], p['b'])
    xp = xp.reshape(S, B, 2, H4).transpose(2, 0, 1, 3)          # [2,S,B,4H]

    out = pl.pallas_call(
        _lstm_recurrence_kernel,
        out_shape=jax.ShapeDtypeStruct((2, S, B, H), jnp.float32),
        grid=(2,),
        in_specs=[pl.BlockSpec((None, S, B, H4), lambda d: (d, 0, 0, 0)),
                  pl.BlockSpec((None, H, H4), lambda d: (d, 0, 0))],
        out_specs=pl.BlockSpec((None, S, B, H), lambda d: (d, 0, 0, 0)),
        compiler_params=pltpu.CompilerParams(
            dimension_semantics=("parallel",),
            vmem_limit_bytes=VMEM_LIMIT_BYTES),
    )(xp, p['whh'])
    # PyTorch BiLSTM layout: [h_forward ; h_backward] along the feature axis.
    return jnp.concatenate([out[0], out[1]], axis=-1)            # [S,B,2H]


# -----------------------------------------------------------------------------
# Kernel 3: TPLinker handshaking ("cat" combine) + packed classification heads,
# tiled over the flattened pair list N = B*P.
# -----------------------------------------------------------------------------
def _tplinker_kernel(hi_ref, hj_ref, wc1_ref, wc2_ref, bc_ref,
                     wh_ref, bh_ref, out_ref):
    """shaking = tanh(hi@Wc1 + hj@Wc2 + bc); out = shaking @ W_heads + b_heads.
    W_heads packs [ent(2) | head_rel(3R) | tail_rel(3R) | zero-pad] columns."""
    shaking = jnp.tanh(
        jnp.dot(hi_ref[...], wc1_ref[...], preferred_element_type=jnp.float32)
        + jnp.dot(hj_ref[...], wc2_ref[...], preferred_element_type=jnp.float32)
        + bc_ref[...])
    out_ref[...] = (jnp.dot(shaking, wh_ref[...],
                            preferred_element_type=jnp.float32) + bh_ref[...])


def tplinker_forward(dec_bsd, tpl, num_relations, tile_n=512):
    B, S, D = dec_bsd.shape
    pairs = np.array([(i, j) for i in range(S) for j in range(i, S)],
                     dtype=np.int32)                             # upper triangle
    P = pairs.shape[0]
    hi = jnp.take(dec_bsd, pairs[:, 0], axis=1).reshape(B * P, D)
    hj = jnp.take(dec_bsd, pairs[:, 1], axis=1).reshape(B * P, D)

    N = B * P
    C_pad = tpl['w_heads'].shape[1]
    tile = min(tile_n, _round_up(N, 8))
    Np = _round_up(N, tile)
    if Np != N:
        hi = jnp.pad(hi, ((0, Np - N), (0, 0)))
        hj = jnp.pad(hj, ((0, Np - N), (0, 0)))

    out = pl.pallas_call(
        _tplinker_kernel,
        out_shape=jax.ShapeDtypeStruct((Np, C_pad), jnp.float32),
        grid=(Np // tile,),
        in_specs=[pl.BlockSpec((tile, D), lambda n: (n, 0)),
                  pl.BlockSpec((tile, D), lambda n: (n, 0)),
                  pl.BlockSpec((D, D), lambda n: (0, 0)),
                  pl.BlockSpec((D, D), lambda n: (0, 0)),
                  pl.BlockSpec((1, D), lambda n: (0, 0)),
                  pl.BlockSpec((D, C_pad), lambda n: (0, 0)),
                  pl.BlockSpec((1, C_pad), lambda n: (0, 0))],
        out_specs=pl.BlockSpec((tile, C_pad), lambda n: (n, 0)),
        compiler_params=pltpu.CompilerParams(
            dimension_semantics=("parallel",),
            vmem_limit_bytes=VMEM_LIMIT_BYTES),
    )(hi, hj, tpl['wc1'], tpl['wc2'], tpl['bc'], tpl['w_heads'], tpl['b_heads'])

    out = out[:N]
    R = num_relations
    h2t = out[:, :2].reshape(B, P, 2)
    h2h = out[:, 2:2 + 3 * R].reshape(B, P, R, 3).transpose(0, 2, 1, 3)
    t2t = out[:, 2 + 3 * R:2 + 6 * R].reshape(B, P, R, 3).transpose(0, 2, 1, 3)
    return h2t, h2h, t2t


# -----------------------------------------------------------------------------
# Parameter packing (PyTorch per-gate layout -> fused kernel layout)
# -----------------------------------------------------------------------------
def init_lstm_dir(key, input_size, hidden, scale=0.1):
    k1, k2, k3, k4 = jax.random.split(key, 4)
    wih = scale * jax.random.normal(k1, (4, input_size, hidden), jnp.float32)
    whh = scale * jax.random.normal(k2, (4, hidden, hidden), jnp.float32)
    b_ih = scale * jax.random.normal(k3, (4, 1, hidden), jnp.float32)
    b_hh = scale * jax.random.normal(k4, (4, 1, hidden), jnp.float32)
    return (wih, whh, b_ih + b_hh)           # gate order i, f, g, o


def _fuse_gate_w(w):                          # [4, I, H] -> [I, 4H]
    four, i_dim, h = w.shape
    return jnp.transpose(w, (1, 0, 2)).reshape(i_dim, four * h)


def _fuse_gate_b(b):                          # [4, 1, H] -> [1, 4H]
    four, _, h = b.shape
    return jnp.transpose(b, (1, 0, 2)).reshape(1, four * h)


def pack_bilstm(fwd, bwd):
    wih_f, whh_f, b_f = fwd
    wih_b, whh_b, b_b = bwd
    return dict(
        wih=jnp.concatenate([_fuse_gate_w(wih_f), _fuse_gate_w(wih_b)], axis=1),
        b=jnp.concatenate([_fuse_gate_b(b_f), _fuse_gate_b(b_b)], axis=1),
        whh=jnp.stack([_fuse_gate_w(whh_f), _fuse_gate_w(whh_b)], axis=0))


def pack_tplinker(wc1, wc2, bc, went, bent, whd, bhd, wtl, btl):
    D = wc1.shape[0]
    R = whd.shape[0]
    C = 2 + 6 * R
    C_pad = _round_up(C, 128)                # lane-dense output columns
    w_heads = jnp.concatenate(
        [went,
         jnp.transpose(whd, (1, 0, 2)).reshape(D, 3 * R),
         jnp.transpose(wtl, (1, 0, 2)).reshape(D, 3 * R)], axis=1)
    b_heads = jnp.concatenate(
        [bent.reshape(1, 2), bhd.reshape(1, 3 * R), btl.reshape(1, 3 * R)], axis=1)
    w_heads = jnp.pad(w_heads, ((0, 0), (0, C_pad - C)))
    b_heads = jnp.pad(b_heads, ((0, 0), (0, C_pad - C)))
    return dict(wc1=wc1, wc2=wc2, bc=bc, w_heads=w_heads, b_heads=b_heads)


# -----------------------------------------------------------------------------
# Full forward (all dropouts are identity in eval/inference mode)
# -----------------------------------------------------------------------------
def tplinker_bilstm_forward(input_ids, packed):
    emb = jnp.take(packed['embedding'], input_ids, axis=0)       # [B,S,E]
    x_tm = jnp.transpose(emb, (1, 0, 2))                         # time-major
    enc = bilstm_layer(x_tm, packed['enc'])                      # [S,B,encH]
    dec = bilstm_layer(enc, packed['dec'])                       # [S,B,decH]
    dec_bsd = jnp.transpose(dec, (1, 0, 2))                      # [B,S,decH]
    return tplinker_forward(dec_bsd, packed['tpl'], packed['num_relations'])


# -----------------------------------------------------------------------------
# Pure-JAX (non-Pallas) reference of the same math, for a numerics check
# -----------------------------------------------------------------------------
def reference_forward(input_ids, raw):
    HIGH = jax.lax.Precision.HIGHEST

    def lstm_dir(x_sbe, wih, whh, b, reverse):
        S, B, _ = x_sbe.shape
        H = whh.shape[-1]

        def step(carry, x_t):
            h, c = carry
            def gate(g):
                return (jnp.dot(x_t, wih[g], precision=HIGH)
                        + jnp.dot(h, whh[g], precision=HIGH) + b[g])
            i = jax.nn.sigmoid(gate(0))
            f = jax.nn.sigmoid(gate(1))
            g_ = jnp.tanh(gate(2))
            o = jax.nn.sigmoid(gate(3))
            c2 = f * c + i * g_
            h2 = o * jnp.tanh(c2)
            return (h2, c2), h2

        xs = x_sbe[::-1] if reverse else x_sbe
        _, hs = lax.scan(step, (jnp.zeros((B, H)), jnp.zeros((B, H))), xs)
        return hs[::-1] if reverse else hs

    def bilstm_ref(x_bse, fwd, bwd):
        x_sbe = jnp.transpose(x_bse, (1, 0, 2))
        of = lstm_dir(x_sbe, *fwd, reverse=False)
        ob = lstm_dir(x_sbe, *bwd, reverse=True)
        return jnp.transpose(jnp.concatenate([of, ob], axis=-1), (1, 0, 2))

    emb = jnp.take(raw['embedding'], input_ids, axis=0)
    enc = bilstm_ref(emb, raw['enc_fwd'], raw['enc_bwd'])
    dec = bilstm_ref(enc, raw['dec_fwd'], raw['dec_bwd'])

    wc1, wc2, bc, went, bent, whd, bhd, wtl, btl = raw['tpl']
    B, S, D = dec.shape
    R = raw['num_relations']
    pairs = np.array([(i, j) for i in range(S) for j in range(i, S)], dtype=np.int32)
    hi = dec[:, pairs[:, 0], :]
    hj = dec[:, pairs[:, 1], :]
    shaking = jnp.tanh(jnp.einsum('bpd,de->bpe', hi, wc1, precision=HIGH)
                       + jnp.einsum('bpd,de->bpe', hj, wc2, precision=HIGH) + bc)
    h2t = jnp.einsum('bpd,dk->bpk', shaking, went, precision=HIGH) + bent
    h2h = (jnp.einsum('bpd,rdk->brpk', shaking, whd, precision=HIGH)
           + bhd.reshape(1, R, 1, 3))
    t2t = (jnp.einsum('bpd,rdk->brpk', shaking, wtl, precision=HIGH)
           + btl.reshape(1, R, 1, 3))
    return h2t, h2h, t2t


# -----------------------------------------------------------------------------
if __name__ == "__main__":
    B, S = 2, 8
    vocab_size, embedding_size = 32, 32
    encoder_hidden, decoder_hidden = 32, 32
    num_relations = 3

    key = jax.random.PRNGKey(0)
    keys = jax.random.split(key, 16)
    embedding = 0.1 * jax.random.normal(keys[0], (vocab_size, embedding_size), jnp.float32)
    enc_fwd = init_lstm_dir(keys[1], embedding_size, encoder_hidden // 2)
    enc_bwd = init_lstm_dir(keys[2], embedding_size, encoder_hidden // 2)
    dec_fwd = init_lstm_dir(keys[3], encoder_hidden, decoder_hidden // 2)
    dec_bwd = init_lstm_dir(keys[4], encoder_hidden, decoder_hidden // 2)

    D = decoder_hidden
    # cat(hi,hj) @ Wc == hi @ Wc1 + hj @ Wc2  (Wc1/Wc2 are the two halves of the
    # PyTorch Linear weight, stored transposed as [in, out]).
    wc1 = 0.1 * jax.random.normal(keys[5], (D, D), jnp.float32)
    wc2 = 0.1 * jax.random.normal(keys[6], (D, D), jnp.float32)
    bc = 0.1 * jax.random.normal(keys[7], (1, D), jnp.float32)
    went = 0.1 * jax.random.normal(keys[8], (D, 2), jnp.float32)
    bent = 0.1 * jax.random.normal(keys[9], (1, 2), jnp.float32)
    whd = 0.1 * jax.random.normal(keys[10], (num_relations, D, 3), jnp.float32)
    bhd = 0.1 * jax.random.normal(keys[11], (num_relations, 1, 3), jnp.float32)
    wtl = 0.1 * jax.random.normal(keys[12], (num_relations, D, 3), jnp.float32)
    btl = 0.1 * jax.random.normal(keys[13], (num_relations, 1, 3), jnp.float32)

    input_ids = jax.random.randint(keys[14], (B, S), 0, vocab_size, dtype=jnp.int32)

    raw = dict(embedding=embedding, enc_fwd=enc_fwd, enc_bwd=enc_bwd,
               dec_fwd=dec_fwd, dec_bwd=dec_bwd,
               tpl=(wc1, wc2, bc, went, bent, whd, bhd, wtl, btl),
               num_relations=num_relations)
    packed = dict(embedding=embedding,
                  enc=pack_bilstm(enc_fwd, enc_bwd),
                  dec=pack_bilstm(dec_fwd, dec_bwd),
                  tpl=pack_tplinker(wc1, wc2, bc, went, bent, whd, bhd, wtl, btl),
                  num_relations=num_relations)

    fwd = jax.jit(lambda ids: tplinker_bilstm_forward(ids, packed))
    h2t, h2h, t2t = fwd(input_ids)
    jax.block_until_ready((h2t, h2h, t2t))

    P = S * (S + 1) // 2
    assert h2t.shape == (B, P, 2)
    assert h2h.shape == (B, num_relations, P, 3)
    assert t2t.shape == (B, num_relations, P, 3)
    assert bool(jnp.all(jnp.isfinite(h2t)))
    assert bool(jnp.all(jnp.isfinite(h2h)))
    assert bool(jnp.all(jnp.isfinite(t2t)))

    # Numerics check against the pure-JAX reference (same per-gate parameters,
    # unfused math) — verifies gate fusion / weight packing / time reversal.
    r_h2t, r_h2h, r_t2t = reference_forward(input_ids, raw)
    for name, a, b in (("h2t", h2t, r_h2t), ("h2h", h2h, r_h2h), ("t2t", t2t, r_t2t)):
        diff = float(jnp.max(jnp.abs(a - b)))
        assert diff < 2e-2, f"{name} mismatch vs reference: max|diff|={diff}"

    print("KERNEL_OK")
</pallas_src>

<mosaic_0001>
module attributes {stable_mosaic.version = 11 : i64} {
  func.func @_matmul_bias_kernel(%arg0: i32, %arg1: memref<16x32xf32, #tpu.memory_space<vmem>>, %arg2: memref<32x128xf32, #tpu.memory_space<vmem>>, %arg3: memref<1x128xf32, #tpu.memory_space<vmem>>, %arg4: memref<16x128xf32, #tpu.memory_space<vmem>>) attributes {dimension_semantics = [#tpu.dimension_semantics<parallel>], iteration_bounds = array<i64: 1>, scalar_prefetch = 0 : i64, scratch_operands = 0 : i64, tpu.core_type = #tpu.core_type<tc>, window_params = [{transform_indices = @transform_0, window_bounds = array<i64: 16, 32>}, {pipeline_mode = #tpu.pipeline_mode<synchronous>, transform_indices = @transform_1, window_bounds = array<i64: 32, 128>}, {pipeline_mode = #tpu.pipeline_mode<synchronous>, transform_indices = @transform_2, window_bounds = array<i64: 1, 128>}, {transform_indices = @transform_3, window_bounds = array<i64: 16, 128>}]} {
    %c0 = arith.constant 0 : index
    %c0_0 = arith.constant 0 : index
    %0 = vector.load %arg1[%c0, %c0_0] : memref<16x32xf32, #tpu.memory_space<vmem>>, vector<16x32xf32>
    %c0_1 = arith.constant 0 : index
    %c0_2 = arith.constant 0 : index
    %1 = vector.load %arg2[%c0_1, %c0_2] : memref<32x128xf32, #tpu.memory_space<vmem>>, vector<32x128xf32>
    %cst = arith.constant dense<0.000000e+00> : vector<16x128xf32>
    %2 = tpu.matmul %0, %1, %cst {dimension_numbers = #tpu.dot_dimension_numbers<[1], [0], [0], [1], [0, 0, 1, 1], [], []>} : vector<16x32xf32>, vector<32x128xf32>, vector<16x128xf32> -> vector<16x128xf32>
    %c0_3 = arith.constant 0 : index
    %c0_4 = arith.constant 0 : index
    %3 = vector.load %arg3[%c0_3, %c0_4] : memref<1x128xf32, #tpu.memory_space<vmem>>, vector<1x128xf32>
    %4 = vector.broadcast %3 : vector<1x128xf32> to vector<16x128xf32>
    %5 = arith.addf %2, %4 : vector<16x128xf32>
    %c0_5 = arith.constant 0 : index
    %c0_6 = arith.constant 0 : index
    %6 = vector.load %arg4[%c0_5, %c0_6] : memref<16x128xf32, #tpu.memory_space<vmem>>, vector<16x128xf32>
    tpu.vector_store %arg4[%c0_5, %c0_6], %5 {strides = array<i32>} : memref<16x128xf32, #tpu.memory_space<vmem>>, vector<16x128xf32>,
    return
  }
  func.func @transform_0(%arg0: i32) -> (i32, i32) {
    %c0_i32 = arith.constant 0 : i32
    %c0_i32_0 = arith.constant 0 : i32
    return %arg0, %c0_i32 : i32, i32
  }
  func.func @transform_1(%arg0: i32) -> (i32, i32) {
    %c0_i32 = arith.constant 0 : i32
    %c0_i32_0 = arith.constant 0 : i32
    %c0_i32_1 = arith.constant 0 : i32
    return %c0_i32, %c0_i32_0 : i32, i32
  }
  func.func @transform_2(%arg0: i32) -> (i32, i32) {
    %c0_i32 = arith.constant 0 : i32
    %c0_i32_0 = arith.constant 0 : i32
    %c0_i32_1 = arith.constant 0 : i32
    return %c0_i32, %c0_i32_0 : i32, i32
  }
  func.func @transform_3(%arg0: i32) -> (i32, i32) {
    %c0_i32 = arith.constant 0 : i32
    %c0_i32_0 = arith.constant 0 : i32
    return %arg0, %c0_i32 : i32, i32
  }
}

module attributes {stable_mosaic.version = 11 : i64} {
  func.func @_lstm_recurrence_kernel(%arg0: i32, %arg1: memref<1x8x2x64xf32, #tpu.memory_space<vmem>>, %arg2: memref<1x16x64xf32, #tpu.memory_space<vmem>>, %arg3: memref<1x8x2x16xf32, #tpu.memory_space<vmem>>) attributes {dimension_semantics = [#tpu.dimension_semantics<parallel>], iteration_bounds = array<i64: 2>, scalar_prefetch = 0 : i64, scratch_operands = 0 : i64, tpu.core_type = #tpu.core_type<tc>, window_params = [{transform_indices = @transform_0, window_bounds = array<i64: 1, 8, 2, 64>}, {transform_indices = @transform_1, window_bounds = array<i64: 1, 16, 64>}, {transform_indices = @transform_2, window_bounds = array<i64: 1, 8, 2, 16>}]} {
    %c0 = arith.constant 0 : index
    %c0_0 = arith.constant 0 : index
    %c0_1 = arith.constant 0 : index
    %0 = vector.load %arg2[%c0, %c0_0, %c0_1] : memref<1x16x64xf32, #tpu.memory_space<vmem>>, vector<1x16x64xf32>
    %1 = vector.shape_cast %0 : vector<1x16x64xf32> to vector<16x64xf32>
    %cst = arith.constant 0.000000e+00 : f32
    %2 = vector.broadcast %cst : f32 to vector<2x16xf32>
    %cst_2 = arith.constant 0.000000e+00 : f32
    %3 = vector.broadcast %cst_2 : f32 to vector<2x16xf32>
    %c0_i32 = arith.constant 0 : i32
    %c0_i32_3 = arith.constant 0 : i32
    %4 = arith.cmpi eq, %arg0, %c0_i32_3 : i32
    %c7_i32 = arith.constant 7 : i32
    %5 = arith.subi %c7_i32, %c0_i32 : i32
    %6 = arith.select %4, %c0_i32, %5 : i32
    %c0_4 = arith.constant 0 : index
    %7 = arith.index_cast %6 : i32 to index
    %c0_5 = arith.constant 0 : index
    %c0_6 = arith.constant 0 : index
    %8 = vector.load %arg1[%c0_4, %7, %c0_5, %c0_6] : memref<1x8x2x64xf32, #tpu.memory_space<vmem>>, vector<1x1x2x64xf32>
    %9 = vector.shape_cast %8 : vector<1x1x2x64xf32> to vector<2x64xf32>
    %cst_7 = arith.constant dense<0.000000e+00> : vector<2x64xf32>
    %10 = tpu.matmul %2, %1, %cst_7 {dimension_numbers = #tpu.dot_dimension_numbers<[1], [0], [0], [1], [0, 0, 1, 1], [], []>} : vector<2x16xf32>, vector<16x64xf32>, vector<2x64xf32> -> vector<2x64xf32>
    %11 = arith.addf %9, %10 : vector<2x64xf32>
    %12 = vector.extract_strided_slice %11 {offsets = [0, 0], sizes = [2, 16], strides = [1, 1]} : vector<2x64xf32> to vector<2x16xf32>
    %13 = arith.negf %12 : vector<2x16xf32>
    %14 = math.exp %13 : vector<2x16xf32>
    %cst_8 = arith.constant 1.000000e+00 : f32
    %15 = vector.broadcast %cst_8 : f32 to vector<2x16xf32>
    %16 = arith.addf %15, %14 : vector<2x16xf32>
    %17 = arith.divf %15, %16 : vector<2x16xf32>
    %18 = vector.extract_strided_slice %11 {offsets = [0, 16], sizes = [2, 16], strides = [1, 1]} : vector<2x64xf32> to vector<2x16xf32>
    %19 = arith.negf %18 : vector<2x16xf32>
    %20 = math.exp %19 : vector<2x16xf32>
    %cst_9 = arith.constant 1.000000e+00 : f32
    %21 = vector.broadcast %cst_9 : f32 to vector<2x16xf32>
    %22 = arith.addf %21, %20 : vector<2x16xf32>
    %23 = arith.divf %21, %22 : vector<2x16xf32>
    %24 = vector.extract_strided_slice %11 {offsets = [0, 32], sizes = [2, 16], strides = [1, 1]} : vector<2x64xf32> to vector<2x16xf32>
    %25 = math.tanh %24 : vector<2x16xf32>
    %26 = vector.extract_strided_slice %11 {offsets = [0, 48], sizes = [2, 16], strides = [1, 1]} : vector<2x64xf32> to vector<2x16xf32>
    %27 = arith.negf %26 : vector<2x16xf32>
    %28 = math.exp %27 : vector<2x16xf32>
    %cst_10 = arith.constant 1.000000e+00 : f32
    %29 = vector.broadcast %cst_10 : f32 to vector<2x16xf32>
    %30 = arith.addf %29, %28 : vector<2x16xf32>
    %31 = arith.divf %29, %30 : vector<2x16xf32>
    %32 = arith.mulf %23, %3 : vector<2x16xf32>
    %33 = arith.mulf %17, %25 : vector<2x16xf32>
    %34 = arith.addf %32, %33 : vector<2x16xf32>
    %35 = math.tanh %34 : vector<2x16xf32>
    %36 = arith.mulf %31, %35 : vector<2x16xf32>
    %c0_11 = arith.constant 0 : index
    %37 = arith.index_cast %6 : i32 to index
    %c0_12 = arith.constant 0 : index
    %c0_13 = arith.constant 0 : index
    %38 = vector.load %arg3[%c0_11, %37, %c0_12, %c0_13] : memref<1x8x2x16xf32, #tpu.memory_space<vmem>>, vector<1x1x2x16xf32>
    %39 = vector.shape_cast %38 : vector<1x1x2x16xf32> to vector<2x16xf32>
    %40 = vector.shape_cast %36 : vector<2x16xf32> to vector<1x1x2x16xf32>
    tpu.vector_store %arg3[%c0_11, %37, %c0_12, %c0_13], %40 {strides = array<i32>} : memref<1x8x2x16xf32, #tpu.memory_space<vmem>>, vector<1x1x2x16xf32>,
    %c1_i32 = arith.constant 1 : i32
    %c0_i32_14 = arith.constant 0 : i32
    %41 = arith.cmpi eq, %arg0, %c0_i32_14 : i32
    %c7_i32_15 = arith.constant 7 : i32
    %42 = arith.subi %c7_i32_15, %c1_i32 : i32
    %43 = arith.select %41, %c1_i32, %42 : i32
    %c0_16 = arith.constant 0 : index
    %44 = arith.index_cast %43 : i32 to index
    %c0_17 = arith.constant 0 : index
    %c0_18 = arith.constant 0 : index
    %45 = vector.load %arg1[%c0_16, %44, %c0_17, %c0_18] : memref<1x8x2x64xf32, #tpu.memory_space<vmem>>, vector<1x1x2x64xf32>
    %46 = vector.shape_cast %45 : vector<1x1x2x64xf32> to vector<2x64xf32>
    %cst_19 = arith.constant dense<0.000000e+00> : vector<2x64xf32>
    %47 = tpu.matmul %36, %1, %cst_19 {dimension_numbers = #tpu.dot_dimension_numbers<[1], [0], [0], [1], [0, 0, 1, 1], [], []>} : vector<2x16xf32>, vector<16x64xf32>, vector<2x64xf32> -> vector<2x64xf32>
    %48 = arith.addf %46, %47 : vector<2x64xf32>
    %49 = vector.extract_strided_slice %48 {offsets = [0, 0], sizes = [2, 16], strides = [1, 1]} : vector<2x64xf32> to vector<2x16xf32>
    %50 = arith.negf %49 : vector<2x16xf32>
    %51 = math.exp %50 : vector<2x16xf32>
    %cst_20 = arith.constant 1.000000e+00 : f32
    %52 = vector.broadcast %cst_20 : f32 to vector<2x16xf32>
    %53 = arith.addf %52, %51 : vector<2x16xf32>
    %54 = arith.divf %52, %53 : vector<2x16xf32>
    %55 = vector.extract_strided_slice %48 {offsets = [0, 16], sizes = [2, 16], strides = [1, 1]} : vector<2x64xf32> to vector<2x16xf32>
    %56 = arith.negf %55 : vector<2x16xf32>
    %57 = math.exp %56 : vector<2x16xf32>
    %cst_21 = arith.constant 1.000000e+00 : f32
    %58 = vector.broadcast %cst_21 : f32 to vector<2x16xf32>
    %59 = arith.addf %58, %57 : vector<2x16xf32>
    %60 = arith.divf %58, %59 : vector<2x16xf32>
    %61 = vector.extract_strided_slice %48 {offsets = [0, 32], sizes = [2, 16], strides = [1, 1]} : vector<2x64xf32> to vector<2x16xf32>
    %62 = math.tanh %61 : vector<2x16xf32>
    %63 = vector.extract_strided_slice %48 {offsets = [0, 48], sizes = [2, 16], strides = [1, 1]} : vector<2x64xf32> to vector<2x16xf32>
    %64 = arith.negf %63 : vector<2x16xf32>
    %65 = math.exp %64 : vector<2x16xf32>
    %cst_22 = arith.constant 1.000000e+00 : f32
    %66 = vector.broadcast %cst_22 : f32 to vector<2x16xf32>
    %67 = arith.addf %66, %65 : vector<2x16xf32>
    %68 = arith.divf %66, %67 : vector<2x16xf32>
    %69 = arith.mulf %60, %34 : vector<2x16xf32>
    %70 = arith.mulf %54, %62 : vector<2x16xf32>
    %71 = arith.addf %69, %70 : vector<2x16xf32>
    %72 = math.tanh %71 : vector<2x16xf32>
    %73 = arith.mulf %68, %72 : vector<2x16xf32>
    %c0_23 = arith.constant 0 : index
    %74 = arith.index_cast %43 : i32 to index
    %c0_24 = arith.constant 0 : index
    %c0_25 = arith.constant 0 : index
    %75 = vector.load %arg3[%c0_23, %74, %c0_24, %c0_25] : memref<1x8x2x16xf32, #tpu.memory_space<vmem>>, vector<1x1x2x16xf32>
    %76 = vector.shape_cast %75 : vector<1x1x2x16xf32> to vector<2x16xf32>
    %77 = vector.shape_cast %73 : vector<2x16xf32> to vector<1x1x2x16xf32>
    tpu.vector_store %arg3[%c0_23, %74, %c0_24, %c0_25], %77 {strides = array<i32>} : memref<1x8x2x16xf32, #tpu.memory_space<vmem>>, vector<1x1x2x16xf32>,
    %c2_i32 = arith.constant 2 : i32
    %c0_i32_26 = arith.constant 0 : i32
    %78 = arith.cmpi eq, %arg0, %c0_i32_26 : i32
    %c7_i32_27 = arith.constant 7 : i32
    %79 = arith.subi %c7_i32_27, %c2_i32 : i32
    %80 = arith.select %78, %c2_i32, %79 : i32
    %c0_28 = arith.constant 0 : index
    %81 = arith.index_cast %80 : i32 to index
    %c0_29 = arith.constant 0 : index
    %c0_30 = arith.constant 0 : index
    %82 = vector.load %arg1[%c0_28, %81, %c0_29, %c0_30] : memref<1x8x2x64xf32, #tpu.memory_space<vmem>>, vector<1x1x2x64xf32>
    %83 = vector.shape_cast %82 : vector<1x1x2x64xf32> to vector<2x64xf32>
    %cst_31 = arith.constant dense<0.000000e+00> : vector<2x64xf32>
    %84 = tpu.matmul %73, %1, %cst_31 {dimension_numbers = #tpu.dot_dimension_numbers<[1], [0], [0], [1], [0, 0, 1, 1], [], []>} : vector<2x16xf32>, vector<16x64xf32>, vector<2x64xf32> -> vector<2x64xf32>
    %85 = arith.addf %83, %84 : vector<2x64xf32>
    %86 = vector.extract_strided_slice %85 {offsets = [0, 0], sizes = [2, 16], strides = [1, 1]} : vector<2x64xf32> to vector<2x16xf32>
    %87 = arith.negf %86 : vector<2x16xf32>
    %88 = math.exp %87 : vector<2x16xf32>
    %cst_32 = arith.constant 1.000000e+00 : f32
    %89 = vector.broadcast %cst_32 : f32 to vector<2x16xf32>
    %90 = arith.addf %89, %88 : vector<2x16xf32>
    %91 = arith.divf %89, %90 : vector<2x16xf32>
    %92 = vector.extract_strided_slice %85 {offsets = [0, 16], sizes = [2, 16], strides = [1, 1]} : vector<2x64xf32> to vector<2x16xf32>
    %93 = arith.negf %92 : vector<2x16xf32>
    %94 = math.exp %93 : vector<2x16xf32>
    %cst_33 = arith.constant 1.000000e+00 : f32
    %95 = vector.broadcast %cst_33 : f32 to vector<2x16xf32>
    %96 = arith.addf %95, %94 : vector<2x16xf32>
    %97 = arith.divf %95, %96 : vector<2x16xf32>
    %98 = vector.extract_strided_slice %85 {offsets = [0, 32], sizes = [2, 16], strides = [1, 1]} : vector<2x64xf32> to vector<2x16xf32>
    %99 = math.tanh %98 : vector<2x16xf32>
    %100 = vector.extract_strided_slice %85 {offsets = [0, 48], sizes = [2, 16], strides = [1, 1]} : vector<2x64xf32> to vector<2x16xf32>
    %101 = arith.negf %100 : vector<2x16xf32>
    %102 = math.exp %101 : vector<2x16xf32>
    %cst_34 = arith.constant 1.000000e+00 : f32
    %103 = vector.broadcast %cst_34 : f32 to vector<2x16xf32>
    %104 = arith.addf %103, %102 : vector<2x16xf32>
    %105 = arith.divf %103, %104 : vector<2x16xf32>
    %106 = arith.mulf %97, %71 : vector<2x16xf32>
    %107 = arith.mulf %91, %99 : vector<2x16xf32>
    %108 = arith.addf %106, %107 : vector<2x16xf32>
    %109 = math.tanh %108 : vector<2x16xf32>
    %110 = arith.mulf %105, %109 : vector<2x16xf32>
    %c0_35 = arith.constant 0 : index
    %111 = arith.index_cast %80 : i32 to index
    %c0_36 = arith.constant 0 : index
    %c0_37 = arith.constant 0 : index
    %112 = vector.load %arg3[%c0_35, %111, %c0_36, %c0_37] : memref<1x8x2x16xf32, #tpu.memory_space<vmem>>, vector<1x1x2x16xf32>
    %113 = vector.shape_cast %112 : vector<1x1x2x16xf32> to vector<2x16xf32>
    %114 = vector.shape_cast %110 : vector<2x16xf32> to vector<1x1x2x16xf32>
    tpu.vector_store %arg3[%c0_35, %111, %c0_36, %c0_37], %114 {strides = array<i32>} : memref<1x8x2x16xf32, #tpu.memory_space<vmem>>, vector<1x1x2x16xf32>,
    %c3_i32 = arith.constant 3 : i32
    %c0_i32_38 = arith.constant 0 : i32
    %115 = arith.cmpi eq, %arg0, %c0_i32_38 : i32
    %c7_i32_39 = arith.constant 7 : i32
    %116 = arith.subi %c7_i32_39, %c3_i32 : i32
    %117 = arith.select %115, %c3_i32, %116 : i32
    %c0_40 = arith.constant 0 : index
    %118 = arith.index_cast %117 : i32 to index
    %c0_41 = arith.constant 0 : index
    %c0_42 = arith.constant 0 : index
    %119 = vector.load %arg1[%c0_40, %118, %c0_41, %c0_42] : memref<1x8x2x64xf32, #tpu.memory_space<vmem>>, vector<1x1x2x64xf32>
    %120 = vector.shape_cast %119 : vector<1x1x2x64xf32> to vector<2x64xf32>
    %cst_43 = arith.constant dense<0.000000e+00> : vector<2x64xf32>
    %121 = tpu.matmul %110, %1, %cst_43 {dimension_numbers = #tpu.dot_dimension_numbers<[1], [0], [0], [1], [0, 0, 1, 1], [], []>} : vector<2x16xf32>, vector<16x64xf32>, vector<2x64xf32> -> vector<2x64xf32>
    %122 = arith.addf %120, %121 : vector<2x64xf32>
    %123 = vector.extract_strided_slice %122 {offsets = [0, 0], sizes = [2, 16], strides = [1, 1]} : vector<2x64xf32> to vector<2x16xf32>
    %124 = arith.negf %123 : vector<2x16xf32>
    %125 = math.exp %124 : vector<2x16xf32>
    %cst_44 = arith.constant 1.000000e+00 : f32
    %126 = vector.broadcast %cst_44 : f32 to vector<2x16xf32>
    %127 = arith.addf %126, %125 : vector<2x16xf32>
    %128 = arith.divf %126, %127 : vector<2x16xf32>
    %129 = vector.extract_strided_slice %122 {offsets = [0, 16], sizes = [2, 16], strides = [1, 1]} : vector<2x64xf32> to vector<2x16xf32>
    %130 = arith.negf %129 : vector<2x16xf32>
    %131 = math.exp %130 : vector<2x16xf32>
    %cst_45 = arith.constant 1.000000e+00 : f32
    %132 = vector.broadcast %cst_45 : f32 to vector<2x16xf32>
    %133 = arith.addf %132, %131 : vector<2x16xf32>
    %134 = arith.divf %132, %133 : vector<2x16xf32>
    %135 = vector.extract_strided_slice %122 {offsets = [0, 32], sizes = [2, 16], strides = [1, 1]} : vector<2x64xf32> to vector<2x16xf32>
    %136 = math.tanh %135 : vector<2x16xf32>
    %137 = vector.extract_strided_slice %122 {offsets = [0, 48], sizes = [2, 16], strides = [1, 1]} : vector<2x64xf32> to vector<2x16xf32>
    %138 = arith.negf %137 : vector<2x16xf32>
    %139 = math.exp %138 : vector<2x16xf32>
    %cst_46 = arith.constant 1.000000e+00 : f32
    %140 = vector.broadcast %cst_46 : f32 to vector<2x16xf32>
    %141 = arith.addf %140, %139 : vector<2x16xf32>
    %142 = arith.divf %140, %141 : vector<2x16xf32>
    %143 = arith.mulf %134, %108 : vector<2x16xf32>
    %144 = arith.mulf %128, %136 : vector<2x16xf32>
    %145 = arith.addf %143, %144 : vector<2x16xf32>
    %146 = math.tanh %145 : vector<2x16xf32>
    %147 = arith.mulf %142, %146 : vector<2x16xf32>
    %c0_47 = arith.constant 0 : index
    %148 = arith.index_cast %117 : i32 to index
    %c0_48 = arith.constant 0 : index
    %c0_49 = arith.constant 0 : index
    %149 = vector.load %arg3[%c0_47, %148, %c0_48, %c0_49] : memref<1x8x2x16xf32, #tpu.memory_space<vmem>>, vector<1x1x2x16xf32>
    %150 = vector.shape_cast %149 : vector<1x1x2x16xf32> to vector<2x16xf32>
    %151 = vector.shape_cast %147 : vector<2x16xf32> to vector<1x1x2x16xf32>
    tpu.vector_store %arg3[%c0_47, %148, %c0_48, %c0_49], %151 {strides = array<i32>} : memref<1x8x2x16xf32, #tpu.memory_space<vmem>>, vector<1x1x2x16xf32>,
    %c4_i32 = arith.constant 4 : i32
    %c0_i32_50 = arith.constant 0 : i32
    %152 = arith.cmpi eq, %arg0, %c0_i32_50 : i32
    %c7_i32_51 = arith.constant 7 : i32
    %153 = arith.subi %c7_i32_51, %c4_i32 : i32
    %154 = arith.select %152, %c4_i32, %153 : i32
    %c0_52 = arith.constant 0 : index
    %155 = arith.index_cast %154 : i32 to index
    %c0_53 = arith.constant 0 : index
    %c0_54 = arith.constant 0 : index
    %156 = vector.load %arg1[%c0_52, %155, %c0_53, %c0_54] : memref<1x8x2x64xf32, #tpu.memory_space<vmem>>, vector<1x1x2x64xf32>
    %157 = vector.shape_cast %156 : vector<1x1x2x64xf32> to vector<2x64xf32>
    %cst_55 = arith.constant dense<0.000000e+00> : vector<2x64xf32>
    %158 = tpu.matmul %147, %1, %cst_55 {dimension_numbers = #tpu.dot_dimension_numbers<[1], [0], [0], [1], [0, 0, 1, 1], [], []>} : vector<2x16xf32>, vector<16x64xf32>, vector<2x64xf32> -> vector<2x64xf32>
    %159 = arith.addf %157, %158 : vector<2x64xf32>
    %160 = vector.extract_strided_slice %159 {offsets = [0, 0], sizes = [2, 16], strides = [1, 1]} : vector<2x64xf32> to vector<2x16xf32>
    %161 = arith.negf %160 : vector<2x16xf32>
    %162 = math.exp %161 : vector<2x16xf32>
    %cst_56 = arith.constant 1.000000e+00 : f32
    %163 = vector.broadcast %cst_56 : f32 to vector<2x16xf32>
    %164 = arith.addf %163, %162 : vector<2x16xf32>
    %165 = arith.divf %163, %164 : vector<2x16xf32>
    %166 = vector.extract_strided_slice %159 {offsets = [0, 16], sizes = [2, 16], strides = [1, 1]} : vector<2x64xf32> to vector<2x16xf32>
    %167 = arith.negf %166 : vector<2x16xf32>
    %168 = math.exp %167 : vector<2x16xf32>
    %cst_57 = arith.constant 1.000000e+00 : f32
    %169 = vector.broadcast %cst_57 : f32 to vector<2x16xf32>
    %170 = arith.addf %169, %168 : vector<2x16xf32>
    %171 = arith.divf %169, %170 : vector<2x16xf32>
    %172 = vector.extract_strided_slice %159 {offsets = [0, 32], sizes = [2, 16], strides = [1, 1]} : vector<2x64xf32> to vector<2x16xf32>
    %173 = math.tanh %172 : vector<2x16xf32>
    %174 = vector.extract_strided_slice %159 {offsets = [0, 48], sizes = [2, 16], strides = [1, 1]} : vector<2x64xf32> to vector<2x16xf32>
    %175 = arith.negf %174 : vector<2x16xf32>
    %176 = math.exp %175 : vector<2x16xf32>
    %cst_58 = arith.constant 1.000000e+00 : f32
    %177 = vector.broadcast %cst_58 : f32 to vector<2x16xf32>
    %178 = arith.addf %177, %176 : vector<2x16xf32>
    %179 = arith.divf %177, %178 : vector<2x16xf32>
    %180 = arith.mulf %171, %145 : vector<2x16xf32>
    %181 = arith.mulf %165, %173 : vector<2x16xf32>
    %182 = arith.addf %180, %181 : vector<2x16xf32>
    %183 = math.tanh %182 : vector<2x16xf32>
    %184 = arith.mulf %179, %183 : vector<2x16xf32>
    %c0_59 = arith.constant 0 : index
    %185 = arith.index_cast %154 : i32 to index
    %c0_60 = arith.constant 0 : index
    %c0_61 = arith.constant 0 : index
    %186 = vector.load %arg3[%c0_59, %185, %c0_60, %c0_61] : memref<1x8x2x16xf32, #tpu.memory_space<vmem>>, vector<1x1x2x16xf32>
    %187 = vector.shape_cast %186 : vector<1x1x2x16xf32> to vector<2x16xf32>
    %188 = vector.shape_cast %184 : vector<2x16xf32> to vector<1x1x2x16xf32>
    tpu.vector_store %arg3[%c0_59, %185, %c0_60, %c0_61], %188 {strides = array<i32>} : memref<1x8x2x16xf32, #tpu.memory_space<vmem>>, vector<1x1x2x16xf32>,
    %c5_i32 = arith.constant 5 : i32
    %c0_i32_62 = arith.constant 0 : i32
    %189 = arith.cmpi eq, %arg0, %c0_i32_62 : i32
    %c7_i32_63 = arith.constant 7 : i32
    %190 = arith.subi %c7_i32_63, %c5_i32 : i32
    %191 = arith.select %189, %c5_i32, %190 : i32
    %c0_64 = arith.constant 0 : index
    %192 = arith.index_cast %191 : i32 to index
    %c0_65 = arith.constant 0 : index
    %c0_66 = arith.constant 0 : index
    %193 = vector.load %arg1[%c0_64, %192, %c0_65, %c0_66] : memref<1x8x2x64xf32, #tpu.memory_space<vmem>>, vector<1x1x2x64xf32>
    %194 = vector.shape_cast %193 : vector<1x1x2x64xf32> to vector<2x64xf32>
    %cst_67 = arith.constant dense<0.000000e+00> : vector<2x64xf32>
    %195 = tpu.matmul %184, %1, %cst_67 {dimension_numbers = #tpu.dot_dimension_numbers<[1], [0], [0], [1], [0, 0, 1, 1], [], []>} : vector<2x16xf32>, vector<16x64xf32>, vector<2x64xf32> -> vector<2x64xf32>
    %196 = arith.addf %194, %195 : vector<2x64xf32>
    %197 = vector.extract_strided_slice %196 {offsets = [0, 0], sizes = [2, 16], strides = [1, 1]} : vector<2x64xf32> to vector<2x16xf32>
    %198 = arith.negf %197 : vector<2x16xf32>
    %199 = math.exp %198 : vector<2x16xf32>
    %cst_68 = arith.constant 1.000000e+00 : f32
    %200 = vector.broadcast %cst_68 : f32 to vector<2x16xf32>
    %201 = arith.addf %200, %199 : vector<2x16xf32>
    %202 = arith.divf %200, %201 : vector<2x16xf32>
    %203 = vector.extract_strided_slice %196 {offsets = [0, 16], sizes = [2, 16], strides = [1, 1]} : vector<2x64xf32> to vector<2x16xf32>
    %204 = arith.negf %203 : vector<2x16xf32>
    %205 = math.exp %204 : vector<2x16xf32>
    %cst_69 = arith.constant 1.000000e+00 : f32
    %206 = vector.broadcast %cst_69 : f32 to vector<2x16xf32>
    %207 = arith.addf %206, %205 : vector<2x16xf32>
    %208 = arith.divf %206, %207 : vector<2x16xf32>
    %209 = vector.extract_strided_slice %196 {offsets = [0, 32], sizes = [2, 16], strides = [1, 1]} : vector<2x64xf32> to vector<2x16xf32>
    %210 = math.tanh %209 : vector<2x16xf32>
    %211 = vector.extract_strided_slice %196 {offsets = [0, 48], sizes = [2, 16], strides = [1, 1]} : vector<2x64xf32> to vector<2x16xf32>
    %212 = arith.negf %211 : vector<2x16xf32>
    %213 = math.exp %212 : vector<2x16xf32>
    %cst_70 = arith.constant 1.000000e+00 : f32
    %214 = vector.broadcast %cst_70 : f32 to vector<2x16xf32>
    %215 = arith.addf %214, %213 : vector<2x16xf32>
    %216 = arith.divf %214, %215 : vector<2x16xf32>
    %217 = arith.mulf %208, %182 : vector<2x16xf32>
    %218 = arith.mulf %202, %210 : vector<2x16xf32>
    %219 = arith.addf %217, %218 : vector<2x16xf32>
    %220 = math.tanh %219 : vector<2x16xf32>
    %221 = arith.mulf %216, %220 : vector<2x16xf32>
    %c0_71 = arith.constant 0 : index
    %222 = arith.index_cast %191 : i32 to index
    %c0_72 = arith.constant 0 : index
    %c0_73 = arith.constant 0 : index
    %223 = vector.load %arg3[%c0_71, %222, %c0_72, %c0_73] : memref<1x8x2x16xf32, #tpu.memory_space<vmem>>, vector<1x1x2x16xf32>
    %224 = vector.shape_cast %223 : vector<1x1x2x16xf32> to vector<2x16xf32>
    %225 = vector.shape_cast %221 : vector<2x16xf32> to vector<1x1x2x16xf32>
    tpu.vector_store %arg3[%c0_71, %222, %c0_72, %c0_73], %225 {strides = array<i32>} : memref<1x8x2x16xf32, #tpu.memory_space<vmem>>, vector<1x1x2x16xf32>,
    %c6_i32 = arith.constant 6 : i32
    %c0_i32_74 = arith.constant 0 : i32
    %226 = arith.cmpi eq, %arg0, %c0_i32_74 : i32
    %c7_i32_75 = arith.constant 7 : i32
    %227 = arith.subi %c7_i32_75, %c6_i32 : i32
    %228 = arith.select %226, %c6_i32, %227 : i32
    %c0_76 = arith.constant 0 : index
    %229 = arith.index_cast %228 : i32 to index
    %c0_77 = arith.constant 0 : index
    %c0_78 = arith.constant 0 : index
    %230 = vector.load %arg1[%c0_76, %229, %c0_77, %c0_78] : memref<1x8x2x64xf32, #tpu.memory_space<vmem>>, vector<1x1x2x64xf32>
    %231 = vector.shape_cast %230 : vector<1x1x2x64xf32> to vector<2x64xf32>
    %cst_79 = arith.constant dense<0.000000e+00> : vector<2x64xf32>
    %232 = tpu.matmul %221, %1, %cst_79 {dimension_numbers = #tpu.dot_dimension_numbers<[1], [0], [0], [1], [0, 0, 1, 1], [], []>} : vector<2x16xf32>, vector<16x64xf32>, vector<2x64xf32> -> vector<2x64xf32>
    %233 = arith.addf %231, %232 : vector<2x64xf32>
    %234 = vector.extract_strided_slice %233 {offsets = [0, 0], sizes = [2, 16], strides = [1, 1]} : vector<2x64xf32> to vector<2x16xf32>
    %235 = arith.negf %234 : vector<2x16xf32>
    %236 = math.exp %235 : vector<2x16xf32>
    %cst_80 = arith.constant 1.000000e+00 : f32
    %237 = vector.broadcast %cst_80 : f32 to vector<2x16xf32>
    %238 = arith.addf %237, %236 : vector<2x16xf32>
    %239 = arith.divf %237, %238 : vector<2x16xf32>
    %240 = vector.extract_strided_slice %233 {offsets = [0, 16], sizes = [2, 16], strides = [1, 1]} : vector<2x64xf32> to vector<2x16xf32>
    %241 = arith.negf %240 : vector<2x16xf32>
    %242 = math.exp %241 : vector<2x16xf32>
    %cst_81 = arith.constant 1.000000e+00 : f32
    %243 = vector.broadcast %cst_81 : f32 to vector<2x16xf32>
    %244 = arith.addf %243, %242 : vector<2x16xf32>
    %245 = arith.divf %243, %244 : vector<2x16xf32>
    %246 = vector.extract_strided_slice %233 {offsets = [0, 32], sizes = [2, 16], strides = [1, 1]} : vector<2x64xf32> to vector<2x16xf32>
    %247 = math.tanh %246 : vector<2x16xf32>
    %248 = vector.extract_strided_slice %233 {offsets = [0, 48], sizes = [2, 16], strides = [1, 1]} : vector<2x64xf32> to vector<2x16xf32>
    %249 = arith.negf %248 : vector<2x16xf32>
    %250 = math.exp %249 : vector<2x16xf32>
    %cst_82 = arith.constant 1.000000e+00 : f32
    %251 = vector.broadcast %cst_82 : f32 to vector<2x16xf32>
    %252 = arith.addf %251, %250 : vector<2x16xf32>
    %253 = arith.divf %251, %252 : vector<2x16xf32>
    %254 = arith.mulf %245, %219 : vector<2x16xf32>
    %255 = arith.mulf %239, %247 : vector<2x16xf32>
    %256 = arith.addf %254, %255 : vector<2x16xf32>
    %257 = math.tanh %256 : vector<2x16xf32>
    %258 = arith.mulf %253, %257 : vector<2x16xf32>
    %c0_83 = arith.constant 0 : index
    %259 = arith.index_cast %228 : i32 to index
    %c0_84 = arith.constant 0 : index
    %c0_85 = arith.constant 0 : index
    %260 = vector.load %arg3[%c0_83, %259, %c0_84, %c0_85] : memref<1x8x2x16xf32, #tpu.memory_space<vmem>>, vector<1x1x2x16xf32>
    %261 = vector.shape_cast %260 : vector<1x1x2x16xf32> to vector<2x16xf32>
    %262 = vector.shape_cast %258 : vector<2x16xf32> to vector<1x1x2x16xf32>
    tpu.vector_store %arg3[%c0_83, %259, %c0_84, %c0_85], %262 {strides = array<i32>} : memref<1x8x2x16xf32, #tpu.memory_space<vmem>>, vector<1x1x2x16xf32>,
    %c7_i32_86 = arith.constant 7 : i32
    %c0_i32_87 = arith.constant 0 : i32
    %263 = arith.cmpi eq, %arg0, %c0_i32_87 : i32
    %c7_i32_88 = arith.constant 7 : i32
    %264 = arith.subi %c7_i32_88, %c7_i32_86 : i32
    %265 = arith.select %263, %c7_i32_86, %264 : i32
    %c0_89 = arith.constant 0 : index
    %266 = arith.index_cast %265 : i32 to index
    %c0_90 = arith.constant 0 : index
    %c0_91 = arith.constant 0 : index
    %267 = vector.load %arg1[%c0_89, %266, %c0_90, %c0_91] : memref<1x8x2x64xf32, #tpu.memory_space<vmem>>, vector<1x1x2x64xf32>
    %268 = vector.shape_cast %267 : vector<1x1x2x64xf32> to vector<2x64xf32>
    %cst_92 = arith.constant dense<0.000000e+00> : vector<2x64xf32>
    %269 = tpu.matmul %258, %1, %cst_92 {dimension_numbers = #tpu.dot_dimension_numbers<[1], [0], [0], [1], [0, 0, 1, 1], [], []>} : vector<2x16xf32>, vector<16x64xf32>, vector<2x64xf32> -> vector<2x64xf32>
    %270 = arith.addf %268, %269 : vector<2x64xf32>
    %271 = vector.extract_strided_slice %270 {offsets = [0, 0], sizes = [2, 16], strides = [1, 1]} : vector<2x64xf32> to vector<2x16xf32>
    %272 = arith.negf %271 : vector<2x16xf32>
    %273 = math.exp %272 : vector<2x16xf32>
    %cst_93 = arith.constant 1.000000e+00 : f32
    %274 = vector.broadcast %cst_93 : f32 to vector<2x16xf32>
    %275 = arith.addf %274, %273 : vector<2x16xf32>
    %276 = arith.divf %274, %275 : vector<2x16xf32>
    %277 = vector.extract_strided_slice %270 {offsets = [0, 16], sizes = [2, 16], strides = [1, 1]} : vector<2x64xf32> to vector<2x16xf32>
    %278 = arith.negf %277 : vector<2x16xf32>
    %279 = math.exp %278 : vector<2x16xf32>
    %cst_94 = arith.constant 1.000000e+00 : f32
    %280 = vector.broadcast %cst_94 : f32 to vector<2x16xf32>
    %281 = arith.addf %280, %279 : vector<2x16xf32>
    %282 = arith.divf %280, %281 : vector<2x16xf32>
    %283 = vector.extract_strided_slice %270 {offsets = [0, 32], sizes = [2, 16], strides = [1, 1]} : vector<2x64xf32> to vector<2x16xf32>
    %284 = math.tanh %283 : vector<2x16xf32>
    %285 = vector.extract_strided_slice %270 {offsets = [0, 48], sizes = [2, 16], strides = [1, 1]} : vector<2x64xf32> to vector<2x16xf32>
    %286 = arith.negf %285 : vector<2x16xf32>
    %287 = math.exp %286 : vector<2x16xf32>
    %cst_95 = arith.constant 1.000000e+00 : f32
    %288 = vector.broadcast %cst_95 : f32 to vector<2x16xf32>
    %289 = arith.addf %288, %287 : vector<2x16xf32>
    %290 = arith.divf %288, %289 : vector<2x16xf32>
    %291 = arith.mulf %282, %256 : vector<2x16xf32>
    %292 = arith.mulf %276, %284 : vector<2x16xf32>
    %293 = arith.addf %291, %292 : vector<2x16xf32>
    %294 = math.tanh %293 : vector<2x16xf32>
    %295 = arith.mulf %290, %294 : vector<2x16xf32>
    %c0_96 = arith.constant 0 : index
    %296 = arith.index_cast %265 : i32 to index
    %c0_97 = arith.constant 0 : index
    %c0_98 = arith.constant 0 : index
    %297 = vector.load %arg3[%c0_96, %296, %c0_97, %c0_98] : memref<1x8x2x16xf32, #tpu.memory_space<vmem>>, vector<1x1x2x16xf32>
    %298 = vector.shape_cast %297 : vector<1x1x2x16xf32> to vector<2x16xf32>
    %299 = vector.shape_cast %295 : vector<2x16xf32> to vector<1x1x2x16xf32>
    tpu.vector_store %arg3[%c0_96, %296, %c0_97, %c0_98], %299 {strides = array<i32>} : memref<1x8x2x16xf32, #tpu.memory_space<vmem>>, vector<1x1x2x16xf32>,
    %c8_i32 = arith.constant 8 : i32
    return
  }
  func.func @transform_0(%arg0: i32) -> (i32, i32, i32, i32) {
    %c0_i32 = arith.constant 0 : i32
    %c0_i32_0 = arith.constant 0 : i32
    %c0_i32_1 = arith.constant 0 : i32
    %c0_i32_2 = arith.constant 0 : i32
    return %arg0, %c0_i32, %c0_i32_0, %c0_i32_1 : i32, i32, i32, i32
  }
  func.func @transform_1(%arg0: i32) -> (i32, i32, i32) {
    %c0_i32 = arith.constant 0 : i32
    %c0_i32_0 = arith.constant 0 : i32
    %c0_i32_1 = arith.constant 0 : i32
    return %arg0, %c0_i32, %c0_i32_0 : i32, i32, i32
  }
  func.func @transform_2(%arg0: i32) -> (i32, i32, i32, i32) {
    %c0_i32 = arith.constant 0 : i32
    %c0_i32_0 = arith.constant 0 : i32
    %c0_i32_1 = arith.constant 0 : i32
    %c0_i32_2 = arith.constant 0 : i32
    return %arg0, %c0_i32, %c0_i32_0, %c0_i32_1 : i32, i32, i32, i32
  }
}

module attributes {stable_mosaic.version = 11 : i64} {
  func.func @_tplinker_kernel(%arg0: i32, %arg1: memref<72x32xf32, #tpu.memory_space<vmem>>, %arg2: memref<72x32xf32, #tpu.memory_space<vmem>>, %arg3: memref<32x32xf32, #tpu.memory_space<vmem>>, %arg4: memref<32x32xf32, #tpu.memory_space<vmem>>, %arg5: memref<1x32xf32, #tpu.memory_space<vmem>>, %arg6: memref<32x128xf32, #tpu.memory_space<vmem>>, %arg7: memref<1x128xf32, #tpu.memory_space<vmem>>, %arg8: memref<72x128xf32, #tpu.memory_space<vmem>>) attributes {dimension_semantics = [#tpu.dimension_semantics<parallel>], iteration_bounds = array<i64: 1>, scalar_prefetch = 0 : i64, scratch_operands = 0 : i64, tpu.core_type = #tpu.core_type<tc>, window_params = [{transform_indices = @transform_0, window_bounds = array<i64: 72, 32>}, {transform_indices = @transform_1, window_bounds = array<i64: 72, 32>}, {pipeline_mode = #tpu.pipeline_mode<synchronous>, transform_indices = @transform_2, window_bounds = array<i64: 32, 32>}, {pipeline_mode = #tpu.pipeline_mode<synchronous>, transform_indices = @transform_3, window_bounds = array<i64: 32, 32>}, {pipeline_mode = #tpu.pipeline_mode<synchronous>, transform_indices = @transform_4, window_bounds = array<i64: 1, 32>}, {pipeline_mode = #tpu.pipeline_mode<synchronous>, transform_indices = @transform_5, window_bounds = array<i64: 32, 128>}, {pipeline_mode = #tpu.pipeline_mode<synchronous>, transform_indices = @transform_6, window_bounds = array<i64: 1, 128>}, {transform_indices = @transform_7, window_bounds = array<i64: 72, 128>}]} {
    %c0 = arith.constant 0 : index
    %c0_0 = arith.constant 0 : index
    %0 = vector.load %arg1[%c0, %c0_0] : memref<72x32xf32, #tpu.memory_space<vmem>>, vector<72x32xf32>
    %c0_1 = arith.constant 0 : index
    %c0_2 = arith.constant 0 : index
    %1 = vector.load %arg3[%c0_1, %c0_2] : memref<32x32xf32, #tpu.memory_space<vmem>>, vector<32x32xf32>
    %cst = arith.constant dense<0.000000e+00> : vector<72x32xf32>
    %2 = tpu.matmul %0, %1, %cst {dimension_numbers = #tpu.dot_dimension_numbers<[1], [0], [0], [1], [0, 0, 1, 1], [], []>} : vector<72x32xf32>, vector<32x32xf32>, vector<72x32xf32> -> vector<72x32xf32>
    %c0_3 = arith.constant 0 : index
    %c0_4 = arith.constant 0 : index
    %3 = vector.load %arg2[%c0_3, %c0_4] : memref<72x32xf32, #tpu.memory_space<vmem>>, vector<72x32xf32>
    %c0_5 = arith.constant 0 : index
    %c0_6 = arith.constant 0 : index
    %4 = vector.load %arg4[%c0_5, %c0_6] : memref<32x32xf32, #tpu.memory_space<vmem>>, vector<32x32xf32>
    %cst_7 = arith.constant dense<0.000000e+00> : vector<72x32xf32>
    %5 = tpu.matmul %3, %4, %cst_7 {dimension_numbers = #tpu.dot_dimension_numbers<[1], [0], [0], [1], [0, 0, 1, 1], [], []>} : vector<72x32xf32>, vector<32x32xf32>, vector<72x32xf32> -> vector<72x32xf32>
    %6 = arith.addf %2, %5 : vector<72x32xf32>
    %c0_8 = arith.constant 0 : index
    %c0_9 = arith.constant 0 : index
    %7 = vector.load %arg5[%c0_8, %c0_9] : memref<1x32xf32, #tpu.memory_space<vmem>>, vector<1x32xf32>
    %8 = vector.broadcast %7 : vector<1x32xf32> to vector<72x32xf32>
    %9 = arith.addf %6, %8 : vector<72x32xf32>
    %10 = math.tanh %9 : vector<72x32xf32>
    %c0_10 = arith.constant 0 : index
    %c0_11 = arith.constant 0 : index
    %11 = vector.load %arg6[%c0_10, %c0_11] : memref<32x128xf32, #tpu.memory_space<vmem>>, vector<32x128xf32>
    %cst_12 = arith.constant dense<0.000000e+00> : vector<72x128xf32>
    %12 = tpu.matmul %10, %11, %cst_12 {dimension_numbers = #tpu.dot_dimension_numbers<[1], [0], [0], [1], [0, 0, 1, 1], [], []>} : vector<72x32xf32>, vector<32x128xf32>, vector<72x128xf32> -> vector<72x128xf32>
    %c0_13 = arith.constant 0 : index
    %c0_14 = arith.constant 0 : index
    %13 = vector.load %arg7[%c0_13, %c0_14] : memref<1x128xf32, #tpu.memory_space<vmem>>, vector<1x128xf32>
    %14 = vector.broadcast %13 : vector<1x128xf32> to vector<72x128xf32>
    %15 = arith.addf %12, %14 : vector<72x128xf32>
    %c0_15 = arith.constant 0 : index
    %c0_16 = arith.constant 0 : index
    %16 = vector.load %arg8[%c0_15, %c0_16] : memref<72x128xf32, #tpu.memory_space<vmem>>, vector<72x128xf32>
    tpu.vector_store %arg8[%c0_15, %c0_16], %15 {strides = array<i32>} : memref<72x128xf32, #tpu.memory_space<vmem>>, vector<72x128xf32>,
    return
  }
  func.func @transform_0(%arg0: i32) -> (i32, i32) {
    %c0_i32 = arith.constant 0 : i32
    %c0_i32_0 = arith.constant 0 : i32
    return %arg0, %c0_i32 : i32, i32
  }
  func.func @transform_1(%arg0: i32) -> (i32, i32) {
    %c0_i32 = arith.constant 0 : i32
    %c0_i32_0 = arith.constant 0 : i32
    return %arg0, %c0_i32 : i32, i32
  }
  func.func @transform_2(%arg0: i32) -> (i32, i32) {
    %c0_i32 = arith.constant 0 : i32
    %c0_i32_0 = arith.constant 0 : i32
    %c0_i32_1 = arith.constant 0 : i32
    return %c0_i32, %c0_i32_0 : i32, i32
  }
  func.func @transform_3(%arg0: i32) -> (i32, i32) {
    %c0_i32 = arith.constant 0 : i32
    %c0_i32_0 = arith.constant 0 : i32
    %c0_i32_1 = arith.constant 0 : i32
    return %c0_i32, %c0_i32_0 : i32, i32
  }
  func.func @transform_4(%arg0: i32) -> (i32, i32) {
    %c0_i32 = arith.constant 0 : i32
    %c0_i32_0 = arith.constant 0 : i32
    %c0_i32_1 = arith.constant 0 : i32
    return %c0_i32, %c0_i32_0 : i32, i32
  }
  func.func @transform_5(%arg0: i32) -> (i32, i32) {
    %c0_i32 = arith.constant 0 : i32
    %c0_i32_0 = arith.constant 0 : i32
    %c0_i32_1 = arith.constant 0 : i32
    return %c0_i32, %c0_i32_0 : i32, i32
  }
  func.func @transform_6(%arg0: i32) -> (i32, i32) {
    %c0_i32 = arith.constant 0 : i32
    %c0_i32_0 = arith.constant 0 : i32
    %c0_i32_1 = arith.constant 0 : i32
    return %c0_i32, %c0_i32_0 : i32, i32
  }
  func.func @transform_7(%arg0: i32) -> (i32, i32) {
    %c0_i32 = arith.constant 0 : i32
    %c0_i32_0 = arith.constant 0 : i32
    return %arg0, %c0_i32 : i32, i32
  }
}

</mosaic_0001>

<bundles_post_ra>
// kernel: _lambda_.5
= control target key start
LH: loop header
LB: loop body
LE: loop exit
PB: predicated region body
PF: predicated region fallthrough
CT: control target
= control target key end

     0   :  { %vm27_vm0 = vcmask 261120   ;;  %s190_s1 = inlined_call_operand.vmem [shape: f32[32,128], index: 1, kind: input, shape index: {}]   ;;  %s191_s0 = inlined_call_operand.vmem [shape: f32[16,32], index: 0, kind: input, shape index: {}]   ;;  %s192_s2 = inlined_call_operand.vmem [shape: f32[1,128], index: 2, kind: input, shape index: {}]   ;;  %s193_s3 = inlined_call_operand.vmem [shape: f32[16,128], index: 3, kind: output, shape index: {}]  }
   0x1   :  { %v16_v0 = vld [vmem:[%s190_s1] sm:$0xff]  ;;  %v17_v1 = vld [vmem:[%s190_s1 + $0x8] sm:$0xff]  ;;  %v18_v2 = vld [vmem:[%s190_s1 + $0x10] sm:$0xff] }
   0x2   :  { %v135_v3 = vpack.c.bf16 %v17_v1, %v16_v0  ;;  %v19_v4 = vld [vmem:[%s190_s1 + $0x18] sm:$0xff]  ;;  %v14_v5 = vld [vmem:[%s191_s0] sm:$0xff]  ;;  %v15_v7 = vld [vmem:[%s191_s0 + $0x8] sm:$0xff] }
   0x3   :  { %v139_v6 = vpack.c.bf16 %v19_v4, %v18_v2  ;;  %132 = vmatprep.mubr.msk.f32.mxu0 %vm27_vm0, %v14_v5  ;;  %v115_v8 = vld [vmem:[%s192_s2] ss:$0 sm:$0xff] }
   0x4   :  { %136 = vmatprep.subr.bf16.mxu0 %v135_v3 }
   0x5   :  { %138 = vmatpush3.bf16.msra.mxu0 %v135_v3 }
   0x6   :  { %140 = vmatprep.subr.bf16.mxu0 %v139_v6 }
   0x9   :  { %142 = vmatpush3.bf16.msra.mxu0 %v139_v6 }
   0xc   :  { %133 = vmatmul.mubr.msk.f32.vlgmr.msra.gmra.mrb[0].mxu0 %vm27_vm0, %v15_v7 }
  0xdf   :  { %v134_v9 = vpop.f32.mrb[0].mxu0 }
  0xe0   :  { %v106_v10 = vadd.f32 %v134_v9, %v115_v8  ;;  %v100_v11 = vpop.f32.mrb[1].mxu0 }
  0xe1   :  { %v101_v12 = vadd.f32 %v115_v8, %v100_v11 }
  0xe2   :  { %110 = vst [vmem:[%s193_s3 + $0x8] sm:$0xff] %v106_v10 }
  0xe3   :  { %109 = vst [vmem:[%s193_s3] sm:$0xff] %v101_v12 }

// kernel: _lambda_.9
= control target key start
LH: loop header
LB: loop body
LE: loop exit
PB: predicated region body
PF: predicated region fallthrough
CT: control target
= control target key end

     0   :  { %v729_v0 = vmov 0.0|0.0   ;;  %vm730_vm0 = vmmov 0   ;;  %v731_v4 = vmov 0.0   ;;  %vm52_vm1 = vcmask 261120   ;;  %s987_s3 = inlined_call_operand.vmem [shape: f32[32,32], index: 3, kind: input, shape index: {}]   ;;  %s988_s2 = inlined_call_operand.vmem [shape: f32[32,32], index: 2, kind: input, shape index: {}]   ;;  %s989_s1 = inlined_call_operand.vmem [shape: f32[72,32], index: 1, kind: input, shape index: {}]   ;;  %s990_s0 = inlined_call_operand.vmem [shape: f32[72,32], index: 0, kind: input, shape index: {}]   ;;  %s991_s5 = inlined_call_operand.vmem [shape: f32[32,128], index: 5, kind: input, shape index: {}]   ;;  %s992_s4 = inlined_call_operand.vmem [shape: f32[1,32], index: 4, kind: input, shape index: {}]   ;;  %s993_s6 = inlined_call_operand.vmem [shape: f32[1,128], index: 6, kind: input, shape index: {}]   ;;  %s994_s7 = inlined_call_operand.vmem [shape: f32[72,128], index: 7, kind: output, shape index: {}]  }
   0x1   :  { %704 = vmatprep.subr.bf16.mxu1 %v729_v0  ;;  %v48_v1 = vld [vmem:[%s987_s3] sm:$0xff]  ;;  %v49_v2 = vld [vmem:[%s987_s3 + $0x8] sm:$0xff]  ;;  %v50_v3 = vld [vmem:[%s987_s3 + $0x10] sm:$0xff]  ;;  %604 = vmatprep.mubr.msk.f32.mxu1 %vm730_vm0, %v731_v4 }
   0x2   :  { %v687_v5 = vpack.c.bf16 %v49_v2, %v48_v1  ;;  %v51_v6 = vld [vmem:[%s987_s3 + $0x18] sm:$0xff]  ;;  %686 = vmatprep.subr.bf16.mxu0 %v729_v0  ;;  %589 = vmatprep.mubr.msk.f32.mxu0 %vm730_vm0, %v731_v4  ;;  %v35_v8 = vld [vmem:[%s988_s2] sm:$0xff]  ;;  %v36_v9 = vld [vmem:[%s988_s2 + $0x8] sm:$0xff] }
   0x3   :  { %v690_v7 = vpack.c.bf16 %v51_v6, %v50_v3  ;;  %v44_v10 = vld [vmem:[%s989_s1 + $0x28] sm:$0xff]  ;;  %v693_v11 = vpack.c.bf16 %v36_v9, %v35_v8  ;;  %v39_v12 = vld [vmem:[%s989_s1] sm:$0xff]  ;;  %v37_v13 = vld [vmem:[%s988_s2 + $0x10] sm:$0xff] }
   0x4   :  { %706 = vmatpush3.bf16.msra.mxu1 %v687_v5  ;;  %688 = vmatpush3.bf16.msra.mxu0 %v687_v5  ;;  %v38_v14 = vld [vmem:[%s988_s2 + $0x18] sm:$0xff]  ;;  %v45_v15 = vld [vmem:[%s989_s1 + $0x30] sm:$0xff]  ;;  %v40_v17 = vld [vmem:[%s989_s1 + $0x8] sm:$0xff] }
   0x5   :  { %705 = vmatprep.subr.bf16.mxu1 %v729_v0  ;;  %689 = vmatprep.subr.bf16.mxu0 %v729_v0  ;;  %v696_v16 = vpack.c.bf16 %v38_v14, %v37_v13  ;;  %v46_v18 = vld [vmem:[%s989_s1 + $0x38] sm:$0xff]  ;;  %v41_v19 = vld [vmem:[%s989_s1 + $0x10] sm:$0xff]  ;;  %v47_v20 = vld [vmem:[%s989_s1 + $0x40] sm:$0xff] }
   0x6   :  { %v42_v21 = vld [vmem:[%s989_s1 + $0x18] sm:$0xff]  ;;  %v26_v22 = vld [vmem:[%s990_s0] sm:$0xff]  ;;  %v27_v24 = vld [vmem:[%s990_s0 + $0x8] sm:$0xff] }
   0x7   :  { %v43_v23 = vld [vmem:[%s989_s1 + $0x20] sm:$0xff]  ;;  %v28_v25 = vld [vmem:[%s990_s0 + $0x10] sm:$0xff]  ;;  %v29_v26 = vld [vmem:[%s990_s0 + $0x18] sm:$0xff] }
   0x8   :  { %707 = vmatpush3.bf16.msra.mxu1 %v690_v7  ;;  %691 = vmatpush3.bf16.msra.mxu0 %v690_v7  ;;  %v30_v27 = vld [vmem:[%s990_s0 + $0x20] sm:$0xff]  ;;  %v31_v28 = vld [vmem:[%s990_s0 + $0x28] sm:$0xff]  ;;  %v32_v29 = vld [vmem:[%s990_s0 + $0x30] sm:$0xff] }
   0x9   :  { %692 = vmatprep.subr.bf16.mxu1 %v729_v0  ;;  %698 = vmatprep.subr.bf16.mxu0 %v729_v0  ;;  %v33_v30 = vld [vmem:[%s990_s0 + $0x38] sm:$0xff]  ;;  %v34_v31 = vld [vmem:[%s990_s0 + $0x40] sm:$0xff]  ;;  %v353_v33 = vld [vmem:[%s991_s5 + $0x8] sm:$0xff] }
   0xa   :  { %v352_v32 = vld [vmem:[%s991_s5] sm:$0xff]  ;;  %v354_v35 = vld [vmem:[%s991_s5 + $0x10] sm:$0xff]  ;;  %v355_v36 = vld [vmem:[%s991_s5 + $0x18] sm:$0xff] }
   0xb   :  { %605 = vmatmul.mubr.msk.f32.vlgmr.msra.gmra.mrb[0].mxu1 %vm52_vm1, %v44_v10  ;;  %590 = vmatmul.mubr.msk.f32.vlgmr.msra.gmra.mrb[0].mxu0 %vm52_vm1, %v39_v12  ;;  %v699_v34 = vpack.c.bf16 %v353_v33, %v352_v32  ;;  %v702_v37 = vpack.c.bf16 %v355_v36, %v354_v35  ;;  %v531_v55 = vld [vmem:[%s992_s4] ss:$0 sm:$0xff] }
   0xc   :  { %694 = vmatpush3.bf16.msra.mxu1 %v693_v11  ;;  %607 = vmatprep.mubr.msk.f32.mxu1 %vm730_vm0, %v731_v4 }
   0xd   :  { %695 = vmatprep.subr.bf16.mxu1 %v729_v0  ;;  %592 = vmatprep.mubr.msk.f32.mxu0 %vm730_vm0, %v731_v4 }
   0xe   :  { %700 = vmatpush3.bf16.msra.mxu0 %v699_v34 }
   0xf   :  { %608 = vmatmul.mubr.msk.f32.gmra.mrb[2].mxu1 %vm52_vm1, %v45_v15  ;;  %593 = vmatmul.mubr.msk.f32.gmra.mrb[2].mxu0 %vm52_vm1, %v40_v17 }
  0x10   :  { %610 = vmatprep.mubr.msk.f32.mxu1 %vm730_vm0, %v731_v4  ;;  %697 = vmatpush3.bf16.msra.mxu1 %v696_v16 }
  0x11   :  { %595 = vmatprep.mubr.msk.f32.mxu0 %vm730_vm0, %v731_v4  ;;  %701 = vmatprep.subr.bf16.mxu0 %v729_v0 }
  0x12   :  { %703 = vmatpush3.bf16.msra.mxu0 %v702_v37 }
  0x13   :  { %611 = vmatmul.mubr.msk.f32.gmra.mrb[4].mxu1 %vm52_vm1, %v46_v18  ;;  %596 = vmatmul.mubr.msk.f32.gmra.mrb[4].mxu0 %vm52_vm1, %v41_v19 }
  0x14   :  { %613 = vmatprep.mubr.msk.f32.mxu1 %vm730_vm0, %v731_v4  ;;  %598 = vmatprep.mubr.msk.f32.mxu0 %vm730_vm0, %v731_v4 }
  0x17   :  { %614 = vmatmul.mubr.msk.f32.gmra.mrb[6].mxu1 %vm52_vm1, %v47_v20  ;;  %599 = vmatmul.mubr.msk.f32.gmra.mrb[6].mxu0 %vm52_vm1, %v42_v21 }
  0x18   :  { %624 = vmatprep.mubr.msk.f32.mxu1 %vm730_vm0, %v731_v4  ;;  %601 = vmatprep.mubr.msk.f32.mxu0 %vm730_vm0, %v731_v4 }
  0x1b   :  { %625 = vmatmul.mubr.msk.f32.vlgmr.msra.gmra.mrb[8].mxu1 %vm52_vm1, %v26_v22  ;;  %602 = vmatmul.mubr.msk.f32.gmra.mrb[8].mxu0 %vm52_vm1, %v43_v23 }
  0x1c   :  { %627 = vmatprep.mubr.msk.f32.mxu1 %vm730_vm0, %v731_v4  ;;  %659 = vmatprep.mubr.msk.f32.mxu0 %vm730_vm0, %v731_v4 }
  0x1f   :  { %628 = vmatmul.mubr.msk.f32.gmra.mrb[10].mxu1 %vm52_vm1, %v27_v24 }
  0x20   :  { %630 = vmatprep.mubr.msk.f32.mxu1 %vm730_vm0, %v731_v4 }
  0x23   :  { %631 = vmatmul.mubr.msk.f32.gmra.mrb[12].mxu1 %vm52_vm1, %v28_v25 }
  0x24   :  { %633 = vmatprep.mubr.msk.f32.mxu1 %vm730_vm0, %v731_v4 }
  0x27   :  { %634 = vmatmul.mubr.msk.f32.gmra.mrb[14].mxu1 %vm52_vm1, %v29_v26 }
  0x28   :  { %636 = vmatprep.mubr.msk.f32.mxu1 %vm730_vm0, %v731_v4 }
  0x2b   :  { %637 = vmatmul.mubr.msk.f32.gmra.mrb[16].mxu1 %vm52_vm1, %v30_v27 }
  0x2c   :  { %639 = vmatprep.mubr.msk.f32.mxu1 %vm730_vm0, %v731_v4 }
  0x2f   :  { %640 = vmatmul.mubr.msk.f32.gmra.mrb[18].mxu1 %vm52_vm1, %v31_v28 }
  0x30   :  { %642 = vmatprep.mubr.msk.f32.mxu1 %vm730_vm0, %v731_v4 }
  0x33   :  { %643 = vmatmul.mubr.msk.f32.gmra.mrb[20].mxu1 %vm52_vm1, %v32_v29 }
  0x34   :  { %645 = vmatprep.mubr.msk.f32.mxu1 %vm730_vm0, %v731_v4 }
  0x37   :  { %646 = vmatmul.mubr.msk.f32.gmra.mrb[22].mxu1 %vm52_vm1, %v33_v30 }
  0x38   :  { %648 = vmatprep.mubr.msk.f32.mxu1 %vm730_vm0, %v731_v4 }
  0x3b   :  { %649 = vmatmul.mubr.msk.f32.gmra.mrb[24].mxu1 %vm52_vm1, %v34_v31 }
  0xde   :  { %v171_v38 = vpop.f32.mrb[0].mxu1  ;;  %v146_v39 = vpop.f32.mrb[0].mxu0 }
  0xdf   :  { %v606_v40 = vpop.f32.mrb[1].mxu1  ;;  %v591_v41 = vpop.f32.mrb[1].mxu0 }
  0xe2   :  { %v176_v42 = vpop.f32.mrb[2].mxu1  ;;  %v151_v43 = vpop.f32.mrb[2].mxu0 }
  0xe3   :  { %v609_v44 = vpop.f32.mrb[3].mxu1  ;;  %v594_v45 = vpop.f32.mrb[3].mxu0 }
  0xe6   :  { %v181_v46 = vpop.f32.mrb[4].mxu1  ;;  %v156_v47 = vpop.f32.mrb[4].mxu0 }
  0xe7   :  { %v612_v48 = vpop.f32.mrb[5].mxu1  ;;  %v597_v49 = vpop.f32.mrb[5].mxu0 }
  0xea   :  { %v926_v50 = vpop.f32.mrb[6].mxu1  ;;  %v161_v51 = vpop.f32.mrb[6].mxu0 }
  0xeb   :  { %v615_v52 = vpop.f32.mrb[7].mxu1  ;;  %v600_v53 = vpop.f32.mrb[7].mxu0 }
  0xee   :  { %v283_v54 = vpop.f32.mrb[8].mxu1  ;;  %v166_v56 = vpop.f32.mrb[8].mxu0 }
  0xef   :  { %v284_v57 = vadd.f32 %v283_v54, %v146_v39  ;;  %v626_v58 = vpop.f32.mrb[9].mxu1  ;;  %v603_v59 = vpop.f32.mrb[9].mxu0  ;;  %v532_v39 = vld [vmem:[%s993_s6] ss:$0 sm:$0xff] }
  0xf1   :  { %v334_v60 = vadd.f32 %v531_v55, %v284_v57 }
  0xf2   :  { %v288_v61 = vpop.f32.mrb[10].mxu1 }
  0xf3   :  { %711 = vtanh.f32 %v334_v60  ;;  %v289_v62 = vadd.f32 %v288_v61, %v151_v43  ;;  %v629_v63 = vpop.f32.mrb[11].mxu1 }
  0xf5   :  { %v335_v0 = vadd.f32 %v531_v55, %v289_v62 }
  0xf6   :  { %v293_v1 = vpop.f32.mrb[12].mxu1 }
  0xf7   :  { %713 = vtanh.f32 %v335_v0  ;;  %v294_v2 = vadd.f32 %v293_v1, %v156_v47  ;;  %v632_v3 = vpop.f32.mrb[13].mxu1 }
  0xf9   :  { %v336_v5 = vadd.f32 %v531_v55, %v294_v2 }
  0xfa   :  { %v298_v6 = vpop.f32.mrb[14].mxu1 }
  0xfb   :  { %715 = vtanh.f32 %v336_v5  ;;  %v299_v7 = vadd.f32 %v298_v6, %v161_v51  ;;  %v635_v8 = vpop.f32.mrb[15].mxu1 }
  0xfd   :  { %v712_v9 = vpop.eup %711  ;;  %v337_v10 = vadd.f32 %v531_v55, %v299_v7 }
  0xfe   :  { %v303_v11 = vpop.f32.mrb[16].mxu1  ;;  %660 = vmatmul.mubr.msk.f32.vlgmr.msra.gmra.mrb[10].mxu0 %vm52_vm1, %v712_v9 }
  0xff   :  { %717 = vtanh.f32 %v337_v10  ;;  %v304_v12 = vadd.f32 %v303_v11, %v166_v56  ;;  %v638_v13 = vpop.f32.mrb[17].mxu1  ;;  %662 = vmatprep.mubr.msk.f32.mxu0 %vm730_vm0, %v731_v4 }
 0x101   :  { %v714_v14 = vpop.eup %713  ;;  %v338_v15 = vadd.f32 %v531_v55, %v304_v12 }
 0x102   :  { %v308_v16 = vpop.f32.mrb[18].mxu1  ;;  %663 = vmatmul.mubr.msk.f32.gmra.mrb[12].mxu0 %vm52_vm1, %v714_v14 }
 0x103   :  { %719 = vtanh.f32 %v338_v15  ;;  %v309_v17 = vadd.f32 %v308_v16, %v171_v38  ;;  %v641_v18 = vpop.f32.mrb[19].mxu1  ;;  %665 = vmatprep.mubr.msk.f32.mxu0 %vm730_vm0, %v731_v4 }
 0x105   :  { %v716_v19 = vpop.eup %715  ;;  %v339_v20 = vadd.f32 %v531_v55, %v309_v17 }
 0x106   :  { %v313_v21 = vpop.f32.mrb[20].mxu1  ;;  %666 = vmatmul.mubr.msk.f32.gmra.mrb[14].mxu0 %vm52_vm1, %v716_v19 }
 0x107   :  { %721 = vtanh.f32 %v339_v20  ;;  %v314_v22 = vadd.f32 %v313_v21, %v176_v42  ;;  %v644_v23 = vpop.f32.mrb[21].mxu1  ;;  %668 = vmatprep.mubr.msk.f32.mxu0 %vm730_vm0, %v731_v4 }
 0x109   :  { %v718_v24 = vpop.eup %717  ;;  %v340_v25 = vadd.f32 %v531_v55, %v314_v22 }
 0x10a   :  { %v318_v26 = vpop.f32.mrb[22].mxu1  ;;  %669 = vmatmul.mubr.msk.f32.gmra.mrb[16].mxu0 %vm52_vm1, %v718_v24 }
 0x10b   :  { %723 = vtanh.f32 %v340_v25  ;;  %v319_v27 = vadd.f32 %v318_v26, %v181_v46  ;;  %v647_v28 = vpop.f32.mrb[23].mxu1  ;;  %671 = vmatprep.mubr.msk.f32.mxu0 %vm730_vm0, %v731_v4 }
 0x10d   :  { %v720_v29 = vpop.eup %719  ;;  %v341_v30 = vadd.f32 %v531_v55, %v319_v27 }
 0x10e   :  { %v323_v31 = vpop.f32.mrb[24].mxu1  ;;  %672 = vmatmul.mubr.msk.f32.gmra.mrb[18].mxu0 %vm52_vm1, %v720_v29 }
 0x10f   :  { %725 = vtanh.f32 %v341_v30  ;;  %v324_v32 = vadd.f32 %v323_v31, %v926_v50  ;;  %v650_v33 = vpop.f32.mrb[25].mxu1  ;;  %674 = vmatprep.mubr.msk.f32.mxu0 %vm730_vm0, %v731_v4 }
 0x111   :  { %v722_v34 = vpop.eup %721  ;;  %v342_v35 = vadd.f32 %v531_v55, %v324_v32 }
 0x112   :  { %675 = vmatmul.mubr.msk.f32.gmra.mrb[20].mxu0 %vm52_vm1, %v722_v34 }
 0x113   :  { %727 = vtanh.f32 %v342_v35  ;;  %677 = vmatprep.mubr.msk.f32.mxu0 %vm730_vm0, %v731_v4 }
 0x115   :  { %v724_v36 = vpop.eup %723 }
 0x116   :  { %678 = vmatmul.mubr.msk.f32.gmra.mrb[22].mxu0 %vm52_vm1, %v724_v36 }
 0x117   :  { %680 = vmatprep.mubr.msk.f32.mxu0 %vm730_vm0, %v731_v4 }
 0x119   :  { %v726_v37 = vpop.eup %725 }
 0x11a   :  { %681 = vmatmul.mubr.msk.f32.gmra.mrb[24].mxu0 %vm52_vm1, %v726_v37 }
 0x11b   :  { %683 = vmatprep.mubr.msk.f32.mxu0 %vm730_vm0, %v731_v4 }
 0x11d   :  { %v728_v38 = vpop.eup %727 }
 0x11e   :  { %684 = vmatmul.mubr.msk.f32.gmra.mrb[26].mxu0 %vm52_vm1, %v728_v38 }
 0x1d1   :  { %v456_v40 = vpop.f32.mrb[10].mxu0 }
 0x1d2   :  { %v457_v41 = vadd.f32 %v532_v39, %v456_v40  ;;  %v661_v42 = vpop.f32.mrb[11].mxu0 }
 0x1d4   :  { %500 = vst [vmem:[%s994_s7] sm:$0xff] %v457_v41 }
 0x1d5   :  { %v461_v43 = vpop.f32.mrb[12].mxu0 }
 0x1d6   :  { %v462_v44 = vadd.f32 %v532_v39, %v461_v43  ;;  %v664_v45 = vpop.f32.mrb[13].mxu0 }
 0x1d8   :  { %501 = vst [vmem:[%s994_s7 + $0x8] sm:$0xff] %v462_v44 }
 0x1d9   :  { %v466_v4 = vpop.f32.mrb[14].mxu0 }
 0x1da   :  { %v467_v46 = vadd.f32 %v532_v39, %v466_v4  ;;  %v667_v47 = vpop.f32.mrb[15].mxu0 }
 0x1dc   :  { %502 = vst [vmem:[%s994_s7 + $0x10] sm:$0xff] %v467_v46 }
 0x1dd   :  { %v471_v48 = vpop.f32.mrb[16].mxu0 }
 0x1de   :  { %v472_v49 = vadd.f32 %v532_v39, %v471_v48  ;;  %v670_v50 = vpop.f32.mrb[17].mxu0 }
 0x1e0   :  { %503 = vst [vmem:[%s994_s7 + $0x18] sm:$0xff] %v472_v49 }
 0x1e1   :  { %v476_v51 = vpop.f32.mrb[18].mxu0 }
 0x1e2   :  { %v477_v52 = vadd.f32 %v532_v39, %v476_v51  ;;  %v673_v53 = vpop.f32.mrb[19].mxu0 }
 0x1e4   :  { %504 = vst [vmem:[%s994_s7 + $0x20] sm:$0xff] %v477_v52 }
 0x1e5   :  { %v481_v54 = vpop.f32.mrb[20].mxu0 }
 0x1e6   :  { %v482_v55 = vadd.f32 %v532_v39, %v481_v54  ;;  %v676_v56 = vpop.f32.mrb[21].mxu0 }
 0x1e8   :  { %505 = vst [vmem:[%s994_s7 + $0x28] sm:$0xff] %v482_v55 }
 0x1e9   :  { %v486_v57 = vpop.f32.mrb[22].mxu0 }
 0x1ea   :  { %v487_v58 = vadd.f32 %v532_v39, %v486_v57  ;;  %v679_v59 = vpop.f32.mrb[23].mxu0 }
 0x1ec   :  { %506 = vst [vmem:[%s994_s7 + $0x30] sm:$0xff] %v487_v58 }
 0x1ed   :  { %v491_v60 = vpop.f32.mrb[24].mxu0 }
 0x1ee   :  { %v492_v61 = vadd.f32 %v532_v39, %v491_v60  ;;  %v682_v62 = vpop.f32.mrb[25].mxu0 }
 0x1f0   :  { %507 = vst [vmem:[%s994_s7 + $0x38] sm:$0xff] %v492_v61 }
 0x1f1   :  { %v496_v63 = vpop.f32.mrb[26].mxu0 }
 0x1f2   :  { %v497_v0 = vadd.f32 %v532_v39, %v496_v63  ;;  %v685_v1 = vpop.f32.mrb[27].mxu0 }
 0x1f4   :  { %508 = vst [vmem:[%s994_s7 + $0x40] sm:$0xff] %v497_v0 }

// kernel: _lambda_.6
= control target key start
LH: loop header
LB: loop body
LE: loop exit
PB: predicated region body
PF: predicated region fallthrough
CT: control target
= control target key end

     0   :  { %s1377_s9 = smov 0   ;;  %s1553_s0 = inlined_call_operand.vmem [shape: f32[2,8,2,64], index: 0, kind: input, shape index: {}]   ;;  %s1554_s1 = inlined_call_operand.vmem [shape: f32[2,16,64], index: 1, kind: input, shape index: {}]   ;;  %s1555_s2 = inlined_call_operand.vmem [shape: f32[2,8,2,16], index: 2, kind: output, shape index: {}]  }
   0x1 LB: > { %s1383_s10 = sadd.s32 4294967295, %s1353_s9   ;;  %p1129_p0 = scmp.ge.s32.totalorder %s1353_s9, 1  ;;  %s1353_s9 = sphi %s1377_s9, %s12_s9  }
   0x2   : > { %p122_p1 = scmp.lt.s32.totalorder %s1353_s9, 3 }
   0x4   : > { %p123_p2 = pnand %p1129_p0, %p122_p1 }
   0x5   : > { %p149_p3 = scmp.lt.s32.totalorder (!%p123_p2), %s1383_s10, 1  ;;  %v1355_v0 = vmov (!%p123_p2), 0.0|0.0   ;;  %vm1356_vm0 = vmmov (!%p123_p2), 0   ;;  %v1357_v1 = vmov (!%p123_p2), 0.0   ;;  %p166_p4 = scmp.eq.s32.totalorder (!%p123_p2), %s1383_s10, 0  ;;  %vm275_vm1 = vcmask (!%p123_p2), 123904  }
   0x6   : > { %126 = sbr.rel (%p123_p2) target bundleno = 5640 (0x1608), region = 28  ;;  %1244 = vmatprep.subr.bf16.mxu0 (!%p123_p2), %v1355_v0  ;;  %1192 = vmatprep.mubr.msk.f32.mxu0 (!%p123_p2), %vm1356_vm0, %v1357_v1  ;;  %s1358_s22 = smov (!%p123_p2), 96   ;;  %vm171_vm2 = vcmask (!%p123_p2), 130048  }
   0x7   : > { %1247 = vmatprep.subr.bf16.mxu1 (!%p123_p2), %v1355_v0  ;;  %1199 = vmatprep.mubr.msk.f32.mxu1 (!%p123_p2), %vm1356_vm0, %v1357_v1  ;;  %s1359_s23 = smov (!%p123_p2), 16   ;;  %s1360_s24 = smov (!%p123_p2), 32  }
   0x8   : > { %s1361_s25 = smov (!%p123_p2), 80  }
   0xd   : > { %s150_s11 = scalar_select %p149_p3, %s1383_s10, 1 }
   0xe   : > { %s1415_s16 = scalar_select %p166_p4, 0, 7 }
   0xf   : > { %s1395_s12 = sshll.u32 %s150_s11, 4 }
  0x10   : > { %s158_s15 = scalar_lea.vmem %s1554_s1, %s1395_s12  ;;  %s1421_s19 = scalar_lea.vmem %s1553_s0, %s1395_s12 }
  0x11   : > { %v164_v2 = vld [vmem:[%s158_s15] sm:$0xff]  ;;  %v165_v3 = vld [vmem:[%s158_s15 + $0x8] sm:$0xff]  ;;  %s1136_s20 = sshll.u32 %s1415_s16, 1  ;;  %s1435_s28 = scalar_lea.vmem %s1555_s2, %s1395_s12 }
  0x12   : > { %v1401_v4 = vpack.c.bf16 %v165_v3, %v164_v2  ;;  %s169_s21 = scalar_lea.vmem %s1421_s19, %s1136_s20  ;;  %s274_s29 = scalar_lea.vmem %s1435_s28, %s1136_s20 }
  0x13   : > { %v170_v5 = vld [vmem:[%s169_s21] sm:$0x3]  ;;  %s1448_s30 = scalar_select %p166_p4, 1, 6 }
  0x14   : > { %1246 = vmatpush3.bf16.msra.mxu0 %v1401_v4  ;;  %1249 = vmatpush3.bf16.msra.mxu1 %v1401_v4  ;;  %s1465_s6 = scalar_select %p166_p4, 2, 5 }
  0x15   : > { %1250 = vmatprep.subr.bf16.mxu0 %v1355_v0  ;;  %1253 = vmatprep.subr.bf16.mxu1 %v1355_v0  ;;  %s1138_s3 = sshll.u32 %s1448_s30, 1 }
  0x16   : > { %s279_s4 = scalar_lea.vmem %s1421_s19, %s1138_s3  ;;  %s382_s5 = scalar_lea.vmem %s1435_s28, %s1138_s3 }
  0x17   : > { %1193 = vmatmul.mubr.f32.vlgmr.msra.gmra.mrb[0].mxu0 %v1357_v1  ;;  %v280_v23 = vld [vmem:[%s279_s4] sm:$0x3]  ;;  %s1141_s7 = sshll.u32 %s1465_s6, 1 }
  0x18   : > { %1252 = vmatpush3.bf16.msra.mxu0 %v1401_v4  ;;  %1206 = vmatprep.mubr.msk.f32.mxu0 %vm1356_vm0, %v1357_v1  ;;  %s386_s8 = scalar_lea.vmem %s1421_s19, %s1141_s7  ;;  %s489_s11 = scalar_lea.vmem %s1435_s28, %s1141_s7 }
  0x19   : > { %1256 = vmatprep.subr.bf16.mxu0 %v1355_v0  ;;  %v387_v41 = vld [vmem:[%s386_s8] sm:$0x3]  ;;  %s1482_s12 = scalar_select %p166_p4, 3, 4 }
  0x1a   : > { %s1498_s16 = scalar_select %p166_p4, 4, 3 }
  0x1b   : > { %s1144_s13 = sshll.u32 %s1482_s12, 1 }
  0x1c   : > { %s493_s14 = scalar_lea.vmem %s1421_s19, %s1144_s13  ;;  %s596_s15 = scalar_lea.vmem %s1435_s28, %s1144_s13 }
  0x1d   : > { %v494_v59 = vld [vmem:[%s493_s14] sm:$0x3]  ;;  %s1147_s17 = sshll.u32 %s1498_s16, 1 }
  0x1e   : > { %s600_s18 = scalar_lea.vmem %s1421_s19, %s1147_s17  ;;  %s703_s20 = scalar_lea.vmem %s1435_s28, %s1147_s17 }
  0x1f   : > { %s1514_s21 = scalar_select %p166_p4, 5, 2 }
  0x20   : > { %s1527_s30 = scalar_select %p166_p4, 6, 1 }
  0x21   : > { %s1150_s26 = sshll.u32 %s1514_s21, 1 }
  0x22   : > { %s707_s27 = scalar_lea.vmem %s1421_s19, %s1150_s26  ;;  %s1153_s3 = sshll.u32 %s1527_s30, 1 }
  0x23   : > { %s814_s4 = scalar_lea.vmem %s1421_s19, %s1153_s3 }
  0x24   : > { %s1540_s6 = scalar_select %p166_p4, 7, 0 }
  0x26   : > { %s1156_s7 = sshll.u32 %s1540_s6, 1 }
  0x27   : > { %s921_s8 = scalar_lea.vmem %s1421_s19, %s1156_s7  ;;  %s1024_s10 = scalar_lea.vmem %s1435_s28, %s1156_s7 }
  0xea   : > { %v241_v6 = vpop.f32.mrb[0].mxu0 }
  0xeb   : > { %v245_v7 = vadd.f32 %v241_v6, %v170_v5  ;;  %v1194_v8 = vpop.f32.mrb[1].mxu0 }
  0xed   : > { %1283 = vtanh.f32 %v245_v7  ;;  %v1137_v10 = vmul.f32 -1.442695, %v245_v7 }
  0xef   : > { %1285 = vpow2.f32 %v1137_v10 }
  0xf7   : > { %v1284_v9 = vpop.eup %1283 }
  0xf8   : > { %255 = vrot.lane.b32.xlu0 %v1284_v9, %s1358_s22 }
  0xf9   : > { %v1286_v11 = vpop.eup %1285 }
  0xfa   : > { %v249_v12 = vadd.f32 1.0, %v1286_v11 }
  0xfc   : > { %1287 = vrcp.f32 %v249_v12 }
 0x106   : > { %v1288_v13 = vpop.eup %1287 }
 0x107   : > { %v253_v16 = vmul.f32 0.0, %v1288_v13 }
 0x16a   : > { %v256_v14 = vpop.permute.xlu0 %255 }
 0x16b   : > { %v258_v15 = vmul.f32 %v1288_v13, %v256_v14 }
 0x16d   : > { %260 = vrot.lane.b32.xlu0 %v258_v15, %s1359_s23  ;;  %v601_v15 = vld [vmem:[%s600_s18] sm:$0x3] }
 0x1df   : > { %v261_v17 = vpop.permute.xlu0 %260 }
 0x1e0   : > { %v263_v18 = vadd.f32 %v261_v17, %v253_v16 }
 0x1e2   : > { %1289 = vtanh.f32 %v263_v18 }
 0x1ec   : > { %v1290_v19 = vpop.eup %1289 }
 0x1ed   : > { %266 = vrot.lane.b32.xlu1 %v1290_v19, %s1360_s24 }
 0x25f   : > { %v267_v20 = vpop.permute.xlu1 %266 }
 0x260   : > { %v269_v21 = vmul.f32 %v1288_v13, %v267_v20 }
 0x262   : > { %271 = vrot.lane.b32.xlu1 %v269_v21, %s1361_s25 }
 0x2d4   : > { %v272_v22 = vpop.permute.xlu1 %271 }
 0x2d5   : > { %276 = vst.msk [vmem:[%s274_s29] sm:$0x3] %vm275_vm1, %v272_v22  ;;  %1200 = vmatmul.mubr.msk.f32.vlgmr.msra.gmra.mrb[0].mxu1 %vm171_vm2, %v272_v22  ;;  %s810_s29 = scalar_lea.vmem %s1435_s28, %s1150_s26 }
 0x2d6   : > { %1255 = vmatpush3.bf16.msra.mxu1 %v1401_v4  ;;  %1213 = vmatprep.mubr.msk.f32.mxu1 %vm1356_vm0, %v1357_v1 }
 0x2d7   : > { %1259 = vmatprep.subr.bf16.mxu1 %v1355_v0 }
 0x3a8   : > { %v349_v24 = vpop.f32.mrb[0].mxu1 }
 0x3a9   : > { %v353_v25 = vadd.f32 %v349_v24, %v280_v23  ;;  %v1201_v26 = vpop.f32.mrb[1].mxu1 }
 0x3ab   : > { %1291 = vtanh.f32 %v353_v25  ;;  %v1140_v28 = vmul.f32 -1.442695, %v353_v25 }
 0x3ad   : > { %1293 = vpow2.f32 %v1140_v28 }
 0x3b5   : > { %v1292_v27 = vpop.eup %1291 }
 0x3b6   : > { %363 = vrot.lane.b32.xlu0 %v1292_v27, %s1358_s22 }
 0x3b7   : > { %v1294_v29 = vpop.eup %1293 }
 0x3b8   : > { %v357_v30 = vadd.f32 1.0, %v1294_v29 }
 0x3ba   : > { %1295 = vrcp.f32 %v357_v30 }
 0x3c4   : > { %v1296_v31 = vpop.eup %1295 }
 0x3c5   : > { %v361_v34 = vmul.f32 %v1296_v31, %v263_v18 }
 0x428   : > { %v364_v32 = vpop.permute.xlu0 %363 }
 0x429   : > { %v366_v33 = vmul.f32 %v1296_v31, %v364_v32 }
 0x42b   : > { %368 = vrot.lane.b32.xlu1 %v366_v33, %s1359_s23  ;;  %v708_v33 = vld [vmem:[%s707_s27] sm:$0x3] }
 0x49d   : > { %v369_v35 = vpop.permute.xlu1 %368 }
 0x49e   : > { %v371_v36 = vadd.f32 %v369_v35, %v361_v34 }
 0x4a0   : > { %1297 = vtanh.f32 %v371_v36 }
 0x4aa   : > { %v1298_v37 = vpop.eup %1297 }
 0x4ab   : > { %374 = vrot.lane.b32.xlu0 %v1298_v37, %s1360_s24 }
 0x51d   : > { %v375_v38 = vpop.permute.xlu0 %374 }
 0x51e   : > { %v377_v39 = vmul.f32 %v1296_v31, %v375_v38 }
 0x520   : > { %379 = vrot.lane.b32.xlu1 %v377_v39, %s1361_s25 }
 0x592   : > { %v380_v40 = vpop.permute.xlu1 %379 }
 0x593   : > { %383 = vst.msk [vmem:[%s382_s5] sm:$0x3] %vm275_vm1, %v380_v40  ;;  %1207 = vmatmul.mubr.msk.f32.vlgmr.msra.gmra.mrb[2].mxu0 %vm171_vm2, %v380_v40  ;;  %s917_s5 = scalar_lea.vmem %s1435_s28, %s1153_s3 }
 0x594   : > { %1258 = vmatpush3.bf16.msra.mxu0 %v1401_v4  ;;  %1220 = vmatprep.mubr.msk.f32.mxu0 %vm1356_vm0, %v1357_v1 }
 0x595   : > { %1262 = vmatprep.subr.bf16.mxu0 %v1355_v0 }
 0x666   : > { %v456_v42 = vpop.f32.mrb[2].mxu0 }
 0x667   : > { %v460_v43 = vadd.f32 %v456_v42, %v387_v41  ;;  %v1208_v44 = vpop.f32.mrb[3].mxu0 }
 0x669   : > { %1299 = vtanh.f32 %v460_v43  ;;  %v1143_v46 = vmul.f32 -1.442695, %v460_v43 }
 0x66b   : > { %1301 = vpow2.f32 %v1143_v46 }
 0x673   : > { %v1300_v45 = vpop.eup %1299 }
 0x674   : > { %470 = vrot.lane.b32.xlu0 %v1300_v45, %s1358_s22 }
 0x675   : > { %v1302_v47 = vpop.eup %1301 }
 0x676   : > { %v464_v48 = vadd.f32 1.0, %v1302_v47 }
 0x678   : > { %1303 = vrcp.f32 %v464_v48 }
 0x682   : > { %v1304_v49 = vpop.eup %1303 }
 0x683   : > { %v468_v52 = vmul.f32 %v1304_v49, %v371_v36 }
 0x6e6   : > { %v471_v50 = vpop.permute.xlu0 %470 }
 0x6e7   : > { %v473_v51 = vmul.f32 %v1304_v49, %v471_v50 }
 0x6e9   : > { %475 = vrot.lane.b32.xlu1 %v473_v51, %s1359_s23 }
 0x75b   : > { %v476_v53 = vpop.permute.xlu1 %475 }
 0x75c   : > { %v478_v54 = vadd.f32 %v476_v53, %v468_v52 }
 0x75e   : > { %1305 = vtanh.f32 %v478_v54 }
 0x768   : > { %v1306_v55 = vpop.eup %1305 }
 0x769   : > { %481 = vrot.lane.b32.xlu0 %v1306_v55, %s1360_s24 }
 0x7db   : > { %v482_v56 = vpop.permute.xlu0 %481 }
 0x7dc   : > { %v484_v57 = vmul.f32 %v1304_v49, %v482_v56  ;;  %v815_v49 = vld [vmem:[%s814_s4] sm:$0x3] }
 0x7de   : > { %486 = vrot.lane.b32.xlu1 %v484_v57, %s1361_s25 }
 0x850   : > { %v487_v58 = vpop.permute.xlu1 %486 }
 0x851   : > { %490 = vst.msk [vmem:[%s489_s11] sm:$0x3] %vm275_vm1, %v487_v58  ;;  %1214 = vmatmul.mubr.msk.f32.vlgmr.msra.gmra.mrb[2].mxu1 %vm171_vm2, %v487_v58 }
 0x852   : > { %1261 = vmatpush3.bf16.msra.mxu1 %v1401_v4  ;;  %1227 = vmatprep.mubr.msk.f32.mxu1 %vm1356_vm0, %v1357_v1 }
 0x853   : > { %1265 = vmatprep.subr.bf16.mxu1 %v1355_v0 }
 0x924   : > { %v563_v60 = vpop.f32.mrb[2].mxu1 }
 0x925   : > { %v567_v61 = vadd.f32 %v563_v60, %v494_v59  ;;  %v1215_v62 = vpop.f32.mrb[3].mxu1 }
 0x927   : > { %1307 = vtanh.f32 %v567_v61  ;;  %v1146_v2 = vmul.f32 -1.442695, %v567_v61 }
 0x929   : > { %1309 = vpow2.f32 %v1146_v2 }
 0x931   : > { %v1308_v63 = vpop.eup %1307 }
 0x932   : > { %577 = vrot.lane.b32.xlu0 %v1308_v63, %s1358_s22 }
 0x933   : > { %v1310_v3 = vpop.eup %1309 }
 0x934   : > { %v571_v5 = vadd.f32 1.0, %v1310_v3 }
 0x936   : > { %1311 = vrcp.f32 %v571_v5 }
 0x940   : > { %v1312_v0 = vpop.eup %1311 }
 0x941   : > { %v575_v8 = vmul.f32 %v1312_v0, %v478_v54 }
 0x9a4   : > { %v578_v6 = vpop.permute.xlu0 %577 }
 0x9a5   : > { %v580_v7 = vmul.f32 %v1312_v0, %v578_v6 }
 0x9a7   : > { %582 = vrot.lane.b32.xlu1 %v580_v7, %s1359_s23 }
 0xa19   : > { %v583_v9 = vpop.permute.xlu1 %582 }
 0xa1a   : > { %v585_v10 = vadd.f32 %v583_v9, %v575_v8 }
 0xa1c   : > { %1313 = vtanh.f32 %v585_v10 }
 0xa26   : > { %v1314_v11 = vpop.eup %1313 }
 0xa27   : > { %588 = vrot.lane.b32.xlu0 %v1314_v11, %s1360_s24 }
 0xa99   : > { %v589_v12 = vpop.permute.xlu0 %588 }
 0xa9a   : > { %v591_v13 = vmul.f32 %v1312_v0, %v589_v12  ;;  %v922_v0 = vld [vmem:[%s921_s8] sm:$0x3] }
 0xa9c   : > { %593 = vrot.lane.b32.xlu1 %v591_v13, %s1361_s25 }
 0xb0e   : > { %v594_v14 = vpop.permute.xlu1 %593 }
 0xb0f   : > { %597 = vst.msk [vmem:[%s596_s15] sm:$0x3] %vm275_vm1, %v594_v14  ;;  %1221 = vmatmul.mubr.msk.f32.vlgmr.msra.gmra.mrb[4].mxu0 %vm171_vm2, %v594_v14 }
 0xb10   : > { %1264 = vmatpush3.bf16.msra.mxu0 %v1401_v4  ;;  %1234 = vmatprep.mubr.msk.f32.mxu0 %vm1356_vm0, %v1357_v1 }
 0xbe2   : > { %v670_v16 = vpop.f32.mrb[4].mxu0 }
 0xbe3   : > { %v674_v17 = vadd.f32 %v670_v16, %v601_v15  ;;  %v1222_v18 = vpop.f32.mrb[5].mxu0 }
 0xbe5   : > { %1315 = vtanh.f32 %v674_v17  ;;  %v1149_v20 = vmul.f32 -1.442695, %v674_v17 }
 0xbe7   : > { %1317 = vpow2.f32 %v1149_v20 }
 0xbef   : > { %v1316_v19 = vpop.eup %1315 }
 0xbf0   : > { %684 = vrot.lane.b32.xlu0 %v1316_v19, %s1358_s22 }
 0xbf1   : > { %v1318_v21 = vpop.eup %1317 }
 0xbf2   : > { %v678_v22 = vadd.f32 1.0, %v1318_v21 }
 0xbf4   : > { %1319 = vrcp.f32 %v678_v22 }
 0xbfe   : > { %v1320_v23 = vpop.eup %1319 }
 0xbff   : > { %v682_v26 = vmul.f32 %v1320_v23, %v585_v10 }
 0xc62   : > { %v685_v24 = vpop.permute.xlu0 %684 }
 0xc63   : > { %v687_v25 = vmul.f32 %v1320_v23, %v685_v24 }
 0xc65   : > { %689 = vrot.lane.b32.xlu1 %v687_v25, %s1359_s23 }
 0xcd7   : > { %v690_v27 = vpop.permute.xlu1 %689 }
 0xcd8   : > { %v692_v28 = vadd.f32 %v690_v27, %v682_v26 }
 0xcda   : > { %1321 = vtanh.f32 %v692_v28 }
 0xce4   : > { %v1322_v29 = vpop.eup %1321 }
 0xce5   : > { %695 = vrot.lane.b32.xlu0 %v1322_v29, %s1360_s24 }
 0xd57   : > { %v696_v30 = vpop.permute.xlu0 %695 }
 0xd58   : > { %v698_v31 = vmul.f32 %v1320_v23, %v696_v30 }
 0xd5a   : > { %700 = vrot.lane.b32.xlu1 %v698_v31, %s1361_s25 }
 0xdcc   : > { %v701_v32 = vpop.permute.xlu1 %700 }
 0xdcd   : > { %704 = vst.msk [vmem:[%s703_s20] sm:$0x3] %vm275_vm1, %v701_v32  ;;  %1228 = vmatmul.mubr.msk.f32.vlgmr.msra.gmra.mrb[4].mxu1 %vm171_vm2, %v701_v32 }
 0xdce   : > { %1267 = vmatpush3.bf16.msra.mxu1 %v1401_v4  ;;  %1241 = vmatprep.mubr.msk.f32.mxu1 %vm1356_vm0, %v1357_v1 }
 0xea0   : > { %v777_v34 = vpop.f32.mrb[4].mxu1 }
 0xea1   : > { %v781_v35 = vadd.f32 %v777_v34, %v708_v33  ;;  %v1229_v36 = vpop.f32.mrb[5].mxu1 }
 0xea3   : > { %1323 = vtanh.f32 %v781_v35  ;;  %v1152_v38 = vmul.f32 -1.442695, %v781_v35 }
 0xea5   : > { %1325 = vpow2.f32 %v1152_v38 }
 0xead   : > { %v1324_v37 = vpop.eup %1323 }
 0xeae   : > { %791 = vrot.lane.b32.xlu0 %v1324_v37, %s1358_s22 }
 0xeaf   : > { %v1326_v4 = vpop.eup %1325 }
 0xeb0   : > { %v785_v39 = vadd.f32 1.0, %v1326_v4 }
 0xeb2   : > { %1327 = vrcp.f32 %v785_v39 }
 0xebc   : > { %v1328_v1 = vpop.eup %1327 }
 0xebd   : > { %v789_v42 = vmul.f32 %v1328_v1, %v692_v28 }
 0xf20   : > { %v792_v40 = vpop.permute.xlu0 %791 }
 0xf21   : > { %v794_v41 = vmul.f32 %v1328_v1, %v792_v40 }
 0xf23   : > { %796 = vrot.lane.b32.xlu1 %v794_v41, %s1359_s23 }
 0xf95   : > { %v797_v43 = vpop.permute.xlu1 %796 }
 0xf96   : > { %v799_v44 = vadd.f32 %v797_v43, %v789_v42 }
 0xf98   : > { %1329 = vtanh.f32 %v799_v44 }
 0xfa2   : > { %v1330_v45 = vpop.eup %1329 }
 0xfa3   : > { %802 = vrot.lane.b32.xlu0 %v1330_v45, %s1360_s24 }
0x1015   : > { %v803_v46 = vpop.permute.xlu0 %802 }
0x1016   : > { %v805_v47 = vmul.f32 %v1328_v1, %v803_v46 }
0x1018   : > { %807 = vrot.lane.b32.xlu1 %v805_v47, %s1361_s25 }
0x108a   : > { %v808_v48 = vpop.permute.xlu1 %807 }
0x108b   : > { %811 = vst.msk [vmem:[%s810_s29] sm:$0x3] %vm275_vm1, %v808_v48  ;;  %1235 = vmatmul.mubr.msk.f32.vlgmr.msra.gmra.mrb[6].mxu0 %vm171_vm2, %v808_v48 }
0x115e   : > { %v884_v50 = vpop.f32.mrb[6].mxu0 }
0x115f   : > { %v888_v51 = vadd.f32 %v884_v50, %v815_v49  ;;  %v1236_v52 = vpop.f32.mrb[7].mxu0 }
0x1161   : > { %1331 = vtanh.f32 %v888_v51  ;;  %v1155_v54 = vmul.f32 -1.442695, %v888_v51 }
0x1163   : > { %1333 = vpow2.f32 %v1155_v54 }
0x116b   : > { %v1332_v53 = vpop.eup %1331 }
0x116c   : > { %898 = vrot.lane.b32.xlu0 %v1332_v53, %s1358_s22 }
0x116d   : > { %v1334_v55 = vpop.eup %1333 }
0x116e   : > { %v892_v56 = vadd.f32 1.0, %v1334_v55 }
0x1170   : > { %1335 = vrcp.f32 %v892_v56 }
0x117a   : > { %v1336_v57 = vpop.eup %1335 }
0x117b   : > { %v896_v60 = vmul.f32 %v1336_v57, %v799_v44 }
0x11de   : > { %v899_v58 = vpop.permute.xlu0 %898 }
0x11df   : > { %v901_v59 = vmul.f32 %v1336_v57, %v899_v58 }
0x11e1   : > { %903 = vrot.lane.b32.xlu1 %v901_v59, %s1359_s23 }
0x1253   : > { %v904_v61 = vpop.permute.xlu1 %903 }
0x1254   : > { %v906_v62 = vadd.f32 %v904_v61, %v896_v60 }
0x1256   : > { %1337 = vtanh.f32 %v906_v62 }
0x1260   : > { %v1338_v63 = vpop.eup %1337 }
0x1261   : > { %909 = vrot.lane.b32.xlu0 %v1338_v63, %s1360_s24 }
0x12d3   : > { %v910_v2 = vpop.permute.xlu0 %909 }
0x12d4   : > { %v912_v3 = vmul.f32 %v1336_v57, %v910_v2 }
0x12d6   : > { %914 = vrot.lane.b32.xlu1 %v912_v3, %s1361_s25 }
0x1348   : > { %v915_v5 = vpop.permute.xlu1 %914 }
0x1349   : > { %918 = vst.msk [vmem:[%s917_s5] sm:$0x3] %vm275_vm1, %v915_v5  ;;  %1242 = vmatmul.mubr.msk.f32.vlgmr.msra.gmra.mrb[6].mxu1 %vm171_vm2, %v915_v5 }
0x141c   : > { %v991_v6 = vpop.f32.mrb[6].mxu1 }
0x141d   : > { %v995_v7 = vadd.f32 %v991_v6, %v922_v0  ;;  %v1243_v8 = vpop.f32.mrb[7].mxu1 }
0x141f   : > { %1339 = vtanh.f32 %v995_v7  ;;  %v1158_v10 = vmul.f32 -1.442695, %v995_v7 }
0x1421   : > { %1341 = vpow2.f32 %v1158_v10 }
0x1429   : > { %v1340_v9 = vpop.eup %1339 }
0x142a   : > { %1005 = vrot.lane.b32.xlu0 %v1340_v9, %s1358_s22 }
0x142b   : > { %v1342_v11 = vpop.eup %1341 }
0x142c   : > { %v999_v12 = vadd.f32 1.0, %v1342_v11 }
0x142e   : > { %1343 = vrcp.f32 %v999_v12 }
0x1438   : > { %v1344_v13 = vpop.eup %1343 }
0x1439   : > { %v1003_v16 = vmul.f32 %v1344_v13, %v906_v62 }
0x149c   : > { %v1006_v14 = vpop.permute.xlu0 %1005 }
0x149d   : > { %v1008_v15 = vmul.f32 %v1344_v13, %v1006_v14 }
0x149f   : > { %1010 = vrot.lane.b32.xlu1 %v1008_v15, %s1359_s23 }
0x1511   : > { %v1011_v17 = vpop.permute.xlu1 %1010 }
0x1512   : > { %v1013_v18 = vadd.f32 %v1011_v17, %v1003_v16 }
0x1514   : > { %1345 = vtanh.f32 %v1013_v18 }
0x151e   : > { %v1346_v19 = vpop.eup %1345 }
0x151f   : > { %1016 = vrot.lane.b32.xlu0 %v1346_v19, %s1360_s24 }
0x1591   : > { %v1017_v20 = vpop.permute.xlu0 %1016 }
0x1592   : > { %v1019_v21 = vmul.f32 %v1344_v13, %v1017_v20 }
0x1594   : > { %1021 = vrot.lane.b32.xlu1 %v1019_v21, %s1361_s25 }
0x1606   : > { %v1022_v22 = vpop.permute.xlu1 %1021 }
0x1607   : > { %1025 = vst.msk [vmem:[%s1024_s10] sm:$0x3] %vm275_vm1, %v1022_v22 }
0x1608 PF: > { %s12_s9 = sadd.s32 1, %s1353_s9  }
0x1609   : > { %p9_p5 = scmp.ge.s32.totalorder %s12_s9, 4  }
0x160b   :  { %11 = sbr.rel (!%p9_p5) target bundleno = 1 (0x1), region = 77 }

</bundles_post_ra>
